<compile_context>
chip_gen: v5e
topology: v5e:2x2
jax: 0.10.0
libtpu: 0.0.40
codegen_flags: <defaults>
</compile_context>

<pallas_src>
import functools

import jax
import jax.numpy as jnp
from jax.experimental import pallas as pl
from jax.experimental.pallas import tpu as pltpu


LANE = 128          # lane-dense padding target for channels / features / output
KH = KW = 3         # conv kernel size
PAD = 1             # 'same' conv padding


# ----------------------------------------------------------------------------
# Fused kernel: one image per grid step.
#   x_ref : (1, H+2, W+2, C_in)  padded NHWC input tile (f32, VMEM-resident)
#   wc_ref: (9*C_in, 128)        conv weight, (kh,kw,Cin) rows, lane-padded
#   bc_ref: (1, 128)             conv bias (f32)
#   w1_ref: (128, 128)           Linear(C->100) weight, zero-padded
#   b1_ref: (1, 128)             its bias (f32)
#   w2_ref: (128, 128)           head Linear(100->1) weight, zero-padded
#   b2_ref: (1, 128)             its bias (f32)
#   o_ref : (1, 1, 128)          lane-dense output; real logit in lane 0
# ----------------------------------------------------------------------------
def _fused_kernel(x_ref, wc_ref, bc_ref, w1_ref, b1_ref, w2_ref, b2_ref, o_ref):
    _, Hp, Wp, c_in = x_ref.shape
    H, W = Hp - 2 * PAD, Wp - 2 * PAD
    HW = H * W
    P = wc_ref.shape[-1]            # 128 (lane-padded width)
    cdt = wc_ref.dtype              # matmul operand dtype (f32 or bf16)

    # ---- conv as 9 accumulated MXU dots over shifted slabs (no im2col) ----
    acc = jnp.zeros((HW, P), jnp.float32)
    for kidx in range(KH * KW):
        dh, dw = divmod(kidx, KW)
        slab = x_ref[0, dh:dh + H, dw:dw + W, :].reshape(HW, c_in)
        wk = wc_ref[kidx * c_in:(kidx + 1) * c_in, :]
        acc = acc + jnp.dot(slab.astype(cdt), wk,
                            preferred_element_type=jnp.float32)
    acts = jnp.maximum(acc + bc_ref[...], 0.0)          # (HW, 128) f32, lane-dense

    # ---- global average pool on the MXU: (1, HW) @ (HW, 128) ----
    pool_row = jnp.full((1, HW), 1.0 / HW, dtype=cdt)
    pooled = jnp.dot(pool_row, acts.astype(cdt),
                     preferred_element_type=jnp.float32)          # (1, 128)

    # ---- Linear(C -> 100) + ReLU  (feature dim padded 100 -> 128) ----
    h = jnp.dot(pooled.astype(cdt), w1_ref[...],
                preferred_element_type=jnp.float32) + b1_ref[...]
    h = jnp.maximum(h, 0.0)                                       # (1, 128)

    # ---- head Linear(100 -> 1)  (output padded 1 -> 128, logit in lane 0) ----
    out = jnp.dot(h.astype(cdt), w2_ref[...],
                  preferred_element_type=jnp.float32) + b2_ref[...]
    o_ref[...] = out.reshape(o_ref.shape).astype(o_ref.dtype)


def _pad_lanes(a, rows=None, cols=LANE):
    """Zero-pad a 2D array up to (rows or a.shape[0], cols)."""
    r = a.shape[0] if rows is None else rows
    out = jnp.zeros((r, cols), a.dtype)
    return out.at[:a.shape[0], :a.shape[1]].set(a)


@functools.partial(jax.jit, static_argnames=("compute_dtype",))
def two_class_classifier_forward(x_nchw, params, compute_dtype=jnp.float32):
    """Forward pass. x_nchw: (N, C_in, H, W) f32. Returns (N,) f32 (scalar if N==1),
    matching the PyTorch module's .squeeze() semantics."""
    N, C_in, H, W = x_nchw.shape

    # NCHW -> NHWC + 'same' conv halo pad (only host-side data prep; the 9x
    # im2col blow-up of the previous version is gone).
    x = jnp.transpose(x_nchw, (0, 2, 3, 1)).astype(jnp.float32)
    x_pad = jnp.pad(x, ((0, 0), (PAD, PAD), (PAD, PAD), (0, 0)))
    Hp, Wp = H + 2 * PAD, W + 2 * PAD

    # Zero-pad weights/biases to 128 lanes (lane-dense MXU N-dim and unmasked
    # stores). bf16 operands / f32 accumulation when compute_dtype=bf16.
    cdt = compute_dtype
    wc = _pad_lanes(params["conv_w"]).astype(cdt)             # (9*C_in, 128)
    bc = _pad_lanes(params["conv_b"])                         # (1, 128)  f32
    w1 = _pad_lanes(params["fc1_w"], rows=LANE).astype(cdt)   # (128, 128)
    b1 = _pad_lanes(params["fc1_b"])                          # (1, 128)  f32
    w2 = _pad_lanes(params["mlp_w"], rows=LANE).astype(cdt)   # (128, 128)
    b2 = _pad_lanes(params["mlp_b"])                          # (1, 128)  f32
    # TODO(synk): at production sizes also stream x itself in bf16 on v6e/v7x.

    const2 = lambda n: (0, 0)   # constant block index -> weights DMA'd once and
                                # kept VMEM-resident across all grid steps

    out = pl.pallas_call(
        _fused_kernel,
        out_shape=jax.ShapeDtypeStruct((N, 1, LANE), jnp.float32),
        grid=(N,),
        in_specs=[
            pl.BlockSpec((1, Hp, Wp, C_in), lambda n: (n, 0, 0, 0)),
            pl.BlockSpec(wc.shape, const2),
            pl.BlockSpec(bc.shape, const2),
            pl.BlockSpec(w1.shape, const2),
            pl.BlockSpec(b1.shape, const2),
            pl.BlockSpec(w2.shape, const2),
            pl.BlockSpec(b2.shape, const2),
        ],
        out_specs=pl.BlockSpec((1, 1, LANE), lambda n: (n, 0, 0)),
        compiler_params=pltpu.CompilerParams(
            dimension_semantics=("parallel",),   # v7x: shard batch over 2 TCs
            vmem_limit_bytes=32 * 1024 * 1024,
        ),
    )(x_pad, wc, bc, w1, b1, w2, b2)

    # Real logit is lane 0; PyTorch .squeeze() drops all size-1 dims.
    return jnp.squeeze(out[:, 0, 0])


def init_params(key, c_in=4, c_conv=8, feat=100):
    ks = jax.random.split(key, 6)
    scale = 0.1
    return {
        # conv weight stored pre-flattened as (kh*kw*C_in, C_out), rows ordered
        # (kh, kw, C_in) to match the in-kernel tap loop.
        "conv_w": scale * jax.random.normal(ks[0], (KH * KW * c_in, c_conv), jnp.float32),
        "conv_b": scale * jax.random.normal(ks[1], (1, c_conv), jnp.float32),
        # Linear weights stored as (in, out)  (PyTorch stores (out, in); y = x W^T + b)
        "fc1_w": scale * jax.random.normal(ks[2], (c_conv, feat), jnp.float32),
        "fc1_b": scale * jax.random.normal(ks[3], (1, feat), jnp.float32),
        "mlp_w": scale * jax.random.normal(ks[4], (feat, 1), jnp.float32),
        "mlp_b": scale * jax.random.normal(ks[5], (1, 1), jnp.float32),
    }


def _reference(x_nchw, params):
    """Pure-JAX f32 reference (unpadded weights) for validation."""
    x = jnp.transpose(x_nchw, (0, 2, 3, 1))
    N, H, W, C = x.shape
    xp = jnp.pad(x, ((0, 0), (PAD, PAD), (PAD, PAD), (0, 0)))
    cols = [xp[:, dh:dh + H, dw:dw + W, :] for dh in range(KH) for dw in range(KW)]
    patches = jnp.concatenate(cols, axis=-1).reshape(N * H * W, KH * KW * C)
    conv = jnp.maximum(patches @ params["conv_w"] + params["conv_b"], 0.0)
    pooled = conv.reshape(N, H * W, -1).mean(axis=1)
    h = jnp.maximum(pooled @ params["fc1_w"] + params["fc1_b"], 0.0)
    return jnp.squeeze(h @ params["mlp_w"] + params["mlp_b"])


if __name__ == "__main__":
    key = jax.random.PRNGKey(0)
    k_x, k_p = jax.random.split(key)

    x = jax.random.normal(k_x, (2, 4, 16, 16), jnp.float32)   # NCHW input
    params = init_params(k_p)

    y_ref = _reference(x, params)

    # f32 path (all generations): must match the reference tightly.
    y_f32 = jax.block_until_ready(
        two_class_classifier_forward(x, params, compute_dtype=jnp.float32))
    assert y_f32.shape == (2,), y_f32.shape
    assert jnp.allclose(y_f32, y_ref, atol=1e-4, rtol=1e-4), (y_f32, y_ref)

    # bf16-operand / f32-accumulate path (v6e/v7x MXU recipe): looser tolerance.
    y_bf16 = jax.block_until_ready(
        two_class_classifier_forward(x, params, compute_dtype=jnp.bfloat16))
    assert y_bf16.shape == (2,), y_bf16.shape
    assert jnp.allclose(y_bf16, y_ref, atol=5e-2, rtol=5e-2), (y_bf16, y_ref)

    print("KERNEL_OK")
</pallas_src>

<mosaic_0001>
module attributes {stable_mosaic.version = 11 : i64} {
  func.func @_fused_kernel(%arg0: i32, %arg1: memref<1x18x18x4xf32, #tpu.memory_space<vmem>>, %arg2: memref<36x128xf32, #tpu.memory_space<vmem>>, %arg3: memref<1x128xf32, #tpu.memory_space<vmem>>, %arg4: memref<128x128xf32, #tpu.memory_space<vmem>>, %arg5: memref<1x128xf32, #tpu.memory_space<vmem>>, %arg6: memref<128x128xf32, #tpu.memory_space<vmem>>, %arg7: memref<1x128xf32, #tpu.memory_space<vmem>>, %arg8: memref<1x1x128xf32, #tpu.memory_space<vmem>>) attributes {dimension_semantics = [#tpu.dimension_semantics<parallel>], iteration_bounds = array<i64: 2>, scalar_prefetch = 0 : i64, scratch_operands = 0 : i64, tpu.core_type = #tpu.core_type<tc>, window_params = [{transform_indices = @transform_0, window_bounds = array<i64: 1, 18, 18, 4>}, {pipeline_mode = #tpu.pipeline_mode<synchronous>, transform_indices = @transform_1, window_bounds = array<i64: 36, 128>}, {pipeline_mode = #tpu.pipeline_mode<synchronous>, transform_indices = @transform_2, window_bounds = array<i64: 1, 128>}, {pipeline_mode = #tpu.pipeline_mode<synchronous>, transform_indices = @transform_3, window_bounds = array<i64: 128, 128>}, {pipeline_mode = #tpu.pipeline_mode<synchronous>, transform_indices = @transform_4, window_bounds = array<i64: 1, 128>}, {pipeline_mode = #tpu.pipeline_mode<synchronous>, transform_indices = @transform_5, window_bounds = array<i64: 128, 128>}, {pipeline_mode = #tpu.pipeline_mode<synchronous>, transform_indices = @transform_6, window_bounds = array<i64: 1, 128>}, {transform_indices = @transform_7, window_bounds = array<i64: 1, 1, 128>}]} {
    %cst = arith.constant 0.000000e+00 : f32
    %0 = vector.broadcast %cst : f32 to vector<256x128xf32>
    %c0 = arith.constant 0 : index
    %c0_0 = arith.constant 0 : index
    %c0_1 = arith.constant 0 : index
    %c0_2 = arith.constant 0 : index
    %1 = vector.load %arg1[%c0, %c0_0, %c0_1, %c0_2] : memref<1x18x18x4xf32, #tpu.memory_space<vmem>>, vector<1x16x16x4xf32>
    %2 = vector.shape_cast %1 : vector<1x16x16x4xf32> to vector<16x16x4xf32>
    %3 = vector.shape_cast %2 : vector<16x16x4xf32> to vector<256x4xf32>
    %c0_3 = arith.constant 0 : index
    %c0_4 = arith.constant 0 : index
    %4 = vector.load %arg2[%c0_3, %c0_4] : memref<36x128xf32, #tpu.memory_space<vmem>>, vector<4x128xf32>
    %cst_5 = arith.constant dense<0.000000e+00> : vector<256x128xf32>
    %5 = tpu.matmul %3, %4, %cst_5 {dimension_numbers = #tpu.dot_dimension_numbers<[1], [0], [0], [1], [0, 0, 1, 1], [], []>} : vector<256x4xf32>, vector<4x128xf32>, vector<256x128xf32> -> vector<256x128xf32>
    %6 = arith.addf %0, %5 : vector<256x128xf32>
    %c0_6 = arith.constant 0 : index
    %c0_7 = arith.constant 0 : index
    %c1 = arith.constant 1 : index
    %c0_8 = arith.constant 0 : index
    %7 = vector.load %arg1[%c0_6, %c0_7, %c1, %c0_8] : memref<1x18x18x4xf32, #tpu.memory_space<vmem>>, vector<1x16x16x4xf32>
    %8 = vector.shape_cast %7 : vector<1x16x16x4xf32> to vector<16x16x4xf32>
    %9 = vector.shape_cast %8 : vector<16x16x4xf32> to vector<256x4xf32>
    %c4 = arith.constant 4 : index
    %c0_9 = arith.constant 0 : index
    %10 = vector.load %arg2[%c4, %c0_9] : memref<36x128xf32, #tpu.memory_space<vmem>>, vector<4x128xf32>
    %cst_10 = arith.constant dense<0.000000e+00> : vector<256x128xf32>
    %11 = tpu.matmul %9, %10, %cst_10 {dimension_numbers = #tpu.dot_dimension_numbers<[1], [0], [0], [1], [0, 0, 1, 1], [], []>} : vector<256x4xf32>, vector<4x128xf32>, vector<256x128xf32> -> vector<256x128xf32>
    %12 = arith.addf %6, %11 : vector<256x128xf32>
    %c0_11 = arith.constant 0 : index
    %c0_12 = arith.constant 0 : index
    %c2 = arith.constant 2 : index
    %c0_13 = arith.constant 0 : index
    %13 = vector.load %arg1[%c0_11, %c0_12, %c2, %c0_13] : memref<1x18x18x4xf32, #tpu.memory_space<vmem>>, vector<1x16x16x4xf32>
    %14 = vector.shape_cast %13 : vector<1x16x16x4xf32> to vector<16x16x4xf32>
    %15 = vector.shape_cast %14 : vector<16x16x4xf32> to vector<256x4xf32>
    %c8 = arith.constant 8 : index
    %c0_14 = arith.constant 0 : index
    %16 = vector.load %arg2[%c8, %c0_14] : memref<36x128xf32, #tpu.memory_space<vmem>>, vector<4x128xf32>
    %cst_15 = arith.constant dense<0.000000e+00> : vector<256x128xf32>
    %17 = tpu.matmul %15, %16, %cst_15 {dimension_numbers = #tpu.dot_dimension_numbers<[1], [0], [0], [1], [0, 0, 1, 1], [], []>} : vector<256x4xf32>, vector<4x128xf32>, vector<256x128xf32> -> vector<256x128xf32>
    %18 = arith.addf %12, %17 : vector<256x128xf32>
    %c0_16 = arith.constant 0 : index
    %c1_17 = arith.constant 1 : index
    %c0_18 = arith.constant 0 : index
    %c0_19 = arith.constant 0 : index
    %19 = vector.load %arg1[%c0_16, %c1_17, %c0_18, %c0_19] : memref<1x18x18x4xf32, #tpu.memory_space<vmem>>, vector<1x16x16x4xf32>
    %20 = vector.shape_cast %19 : vector<1x16x16x4xf32> to vector<16x16x4xf32>
    %21 = vector.shape_cast %20 : vector<16x16x4xf32> to vector<256x4xf32>
    %c12 = arith.constant 12 : index
    %c0_20 = arith.constant 0 : index
    %22 = vector.load %arg2[%c12, %c0_20] : memref<36x128xf32, #tpu.memory_space<vmem>>, vector<4x128xf32>
    %cst_21 = arith.constant dense<0.000000e+00> : vector<256x128xf32>
    %23 = tpu.matmul %21, %22, %cst_21 {dimension_numbers = #tpu.dot_dimension_numbers<[1], [0], [0], [1], [0, 0, 1, 1], [], []>} : vector<256x4xf32>, vector<4x128xf32>, vector<256x128xf32> -> vector<256x128xf32>
    %24 = arith.addf %18, %23 : vector<256x128xf32>
    %c0_22 = arith.constant 0 : index
    %c1_23 = arith.constant 1 : index
    %c1_24 = arith.constant 1 : index
    %c0_25 = arith.constant 0 : index
    %25 = vector.load %arg1[%c0_22, %c1_23, %c1_24, %c0_25] : memref<1x18x18x4xf32, #tpu.memory_space<vmem>>, vector<1x16x16x4xf32>
    %26 = vector.shape_cast %25 : vector<1x16x16x4xf32> to vector<16x16x4xf32>
    %27 = vector.shape_cast %26 : vector<16x16x4xf32> to vector<256x4xf32>
    %c16 = arith.constant 16 : index
    %c0_26 = arith.constant 0 : index
    %28 = vector.load %arg2[%c16, %c0_26] : memref<36x128xf32, #tpu.memory_space<vmem>>, vector<4x128xf32>
    %cst_27 = arith.constant dense<0.000000e+00> : vector<256x128xf32>
    %29 = tpu.matmul %27, %28, %cst_27 {dimension_numbers = #tpu.dot_dimension_numbers<[1], [0], [0], [1], [0, 0, 1, 1], [], []>} : vector<256x4xf32>, vector<4x128xf32>, vector<256x128xf32> -> vector<256x128xf32>
    %30 = arith.addf %24, %29 : vector<256x128xf32>
    %c0_28 = arith.constant 0 : index
    %c1_29 = arith.constant 1 : index
    %c2_30 = arith.constant 2 : index
    %c0_31 = arith.constant 0 : index
    %31 = vector.load %arg1[%c0_28, %c1_29, %c2_30, %c0_31] : memref<1x18x18x4xf32, #tpu.memory_space<vmem>>, vector<1x16x16x4xf32>
    %32 = vector.shape_cast %31 : vector<1x16x16x4xf32> to vector<16x16x4xf32>
    %33 = vector.shape_cast %32 : vector<16x16x4xf32> to vector<256x4xf32>
    %c20 = arith.constant 20 : index
    %c0_32 = arith.constant 0 : index
    %34 = vector.load %arg2[%c20, %c0_32] : memref<36x128xf32, #tpu.memory_space<vmem>>, vector<4x128xf32>
    %cst_33 = arith.constant dense<0.000000e+00> : vector<256x128xf32>
    %35 = tpu.matmul %33, %34, %cst_33 {dimension_numbers = #tpu.dot_dimension_numbers<[1], [0], [0], [1], [0, 0, 1, 1], [], []>} : vector<256x4xf32>, vector<4x128xf32>, vector<256x128xf32> -> vector<256x128xf32>
    %36 = arith.addf %30, %35 : vector<256x128xf32>
    %c0_34 = arith.constant 0 : index
    %c2_35 = arith.constant 2 : index
    %c0_36 = arith.constant 0 : index
    %c0_37 = arith.constant 0 : index
    %37 = vector.load %arg1[%c0_34, %c2_35, %c0_36, %c0_37] : memref<1x18x18x4xf32, #tpu.memory_space<vmem>>, vector<1x16x16x4xf32>
    %38 = vector.shape_cast %37 : vector<1x16x16x4xf32> to vector<16x16x4xf32>
    %39 = vector.shape_cast %38 : vector<16x16x4xf32> to vector<256x4xf32>
    %c24 = arith.constant 24 : index
    %c0_38 = arith.constant 0 : index
    %40 = vector.load %arg2[%c24, %c0_38] : memref<36x128xf32, #tpu.memory_space<vmem>>, vector<4x128xf32>
    %cst_39 = arith.constant dense<0.000000e+00> : vector<256x128xf32>
    %41 = tpu.matmul %39, %40, %cst_39 {dimension_numbers = #tpu.dot_dimension_numbers<[1], [0], [0], [1], [0, 0, 1, 1], [], []>} : vector<256x4xf32>, vector<4x128xf32>, vector<256x128xf32> -> vector<256x128xf32>
    %42 = arith.addf %36, %41 : vector<256x128xf32>
    %c0_40 = arith.constant 0 : index
    %c2_41 = arith.constant 2 : index
    %c1_42 = arith.constant 1 : index
    %c0_43 = arith.constant 0 : index
    %43 = vector.load %arg1[%c0_40, %c2_41, %c1_42, %c0_43] : memref<1x18x18x4xf32, #tpu.memory_space<vmem>>, vector<1x16x16x4xf32>
    %44 = vector.shape_cast %43 : vector<1x16x16x4xf32> to vector<16x16x4xf32>
    %45 = vector.shape_cast %44 : vector<16x16x4xf32> to vector<256x4xf32>
    %c28 = arith.constant 28 : index
    %c0_44 = arith.constant 0 : index
    %46 = vector.load %arg2[%c28, %c0_44] : memref<36x128xf32, #tpu.memory_space<vmem>>, vector<4x128xf32>
    %cst_45 = arith.constant dense<0.000000e+00> : vector<256x128xf32>
    %47 = tpu.matmul %45, %46, %cst_45 {dimension_numbers = #tpu.dot_dimension_numbers<[1], [0], [0], [1], [0, 0, 1, 1], [], []>} : vector<256x4xf32>, vector<4x128xf32>, vector<256x128xf32> -> vector<256x128xf32>
    %48 = arith.addf %42, %47 : vector<256x128xf32>
    %c0_46 = arith.constant 0 : index
    %c2_47 = arith.constant 2 : index
    %c2_48 = arith.constant 2 : index
    %c0_49 = arith.constant 0 : index
    %49 = vector.load %arg1[%c0_46, %c2_47, %c2_48, %c0_49] : memref<1x18x18x4xf32, #tpu.memory_space<vmem>>, vector<1x16x16x4xf32>
    %50 = vector.shape_cast %49 : vector<1x16x16x4xf32> to vector<16x16x4xf32>
    %51 = vector.shape_cast %50 : vector<16x16x4xf32> to vector<256x4xf32>
    %c32 = arith.constant 32 : index
    %c0_50 = arith.constant 0 : index
    %52 = vector.load %arg2[%c32, %c0_50] : memref<36x128xf32, #tpu.memory_space<vmem>>, vector<4x128xf32>
    %cst_51 = arith.constant dense<0.000000e+00> : vector<256x128xf32>
    %53 = tpu.matmul %51, %52, %cst_51 {dimension_numbers = #tpu.dot_dimension_numbers<[1], [0], [0], [1], [0, 0, 1, 1], [], []>} : vector<256x4xf32>, vector<4x128xf32>, vector<256x128xf32> -> vector<256x128xf32>
    %54 = arith.addf %48, %53 : vector<256x128xf32>
    %c0_52 = arith.constant 0 : index
    %c0_53 = arith.constant 0 : index
    %55 = vector.load %arg3[%c0_52, %c0_53] : memref<1x128xf32, #tpu.memory_space<vmem>>, vector<1x128xf32>
    %56 = vector.broadcast %55 : vector<1x128xf32> to vector<256x128xf32>
    %57 = arith.addf %54, %56 : vector<256x128xf32>
    %cst_54 = arith.constant 0.000000e+00 : f32
    %58 = vector.broadcast %cst_54 : f32 to vector<256x128xf32>
    %59 = arith.maximumf %57, %58 : vector<256x128xf32>
    %cst_55 = arith.constant 3.906250e-03 : f32
    %60 = vector.broadcast %cst_55 : f32 to vector<1x256xf32>
    %cst_56 = arith.constant dense<0.000000e+00> : vector<1x128xf32>
    %61 = tpu.matmul %60, %59, %cst_56 {dimension_numbers = #tpu.dot_dimension_numbers<[1], [0], [0], [1], [0, 0, 1, 1], [], []>} : vector<1x256xf32>, vector<256x128xf32>, vector<1x128xf32> -> vector<1x128xf32>
    %c0_57 = arith.constant 0 : index
    %c0_58 = arith.constant 0 : index
    %62 = vector.load %arg4[%c0_57, %c0_58] : memref<128x128xf32, #tpu.memory_space<vmem>>, vector<128x128xf32>
    %cst_59 = arith.constant dense<0.000000e+00> : vector<1x128xf32>
    %63 = tpu.matmul %61, %62, %cst_59 {dimension_numbers = #tpu.dot_dimension_numbers<[1], [0], [0], [1], [0, 0, 1, 1], [], []>} : vector<1x128xf32>, vector<128x128xf32>, vector<1x128xf32> -> vector<1x128xf32>
    %c0_60 = arith.constant 0 : index
    %c0_61 = arith.constant 0 : index
    %64 = vector.load %arg5[%c0_60, %c0_61] : memref<1x128xf32, #tpu.memory_space<vmem>>, vector<1x128xf32>
    %65 = arith.addf %63, %64 : vector<1x128xf32>
    %cst_62 = arith.constant 0.000000e+00 : f32
    %66 = vector.broadcast %cst_62 : f32 to vector<1x128xf32>
    %67 = arith.maximumf %65, %66 : vector<1x128xf32>
    %c0_63 = arith.constant 0 : index
    %c0_64 = arith.constant 0 : index
    %68 = vector.load %arg6[%c0_63, %c0_64] : memref<128x128xf32, #tpu.memory_space<vmem>>, vector<128x128xf32>
    %cst_65 = arith.constant dense<0.000000e+00> : vector<1x128xf32>
    %69 = tpu.matmul %67, %68, %cst_65 {dimension_numbers = #tpu.dot_dimension_numbers<[1], [0], [0], [1], [0, 0, 1, 1], [], []>} : vector<1x128xf32>, vector<128x128xf32>, vector<1x128xf32> -> vector<1x128xf32>
    %c0_66 = arith.constant 0 : index
    %c0_67 = arith.constant 0 : index
    %70 = vector.load %arg7[%c0_66, %c0_67] : memref<1x128xf32, #tpu.memory_space<vmem>>, vector<1x128xf32>
    %71 = arith.addf %69, %70 : vector<1x128xf32>
    %72 = vector.shape_cast %71 : vector<1x128xf32> to vector<1x1x128xf32>
    %c0_68 = arith.constant 0 : index
    %c0_69 = arith.constant 0 : index
    %c0_70 = arith.constant 0 : index
    %73 = vector.load %arg8[%c0_68, %c0_69, %c0_70] : memref<1x1x128xf32, #tpu.memory_space<vmem>>, vector<1x1x128xf32>
    tpu.vector_store %arg8[%c0_68, %c0_69, %c0_70], %72 {strides = array<i32>} : memref<1x1x128xf32, #tpu.memory_space<vmem>>, vector<1x1x128xf32>,
    return
  }
  func.func @transform_0(%arg0: i32) -> (i32, i32, i32, i32) {
    %c0_i32 = arith.constant 0 : i32
    %c0_i32_0 = arith.constant 0 : i32
    %c0_i32_1 = arith.constant 0 : i32
    %c0_i32_2 = arith.constant 0 : i32
    return %arg0, %c0_i32, %c0_i32_0, %c0_i32_1 : i32, i32, i32, i32
  }
  func.func @transform_1(%arg0: i32) -> (i32, i32) {
    %c0_i32 = arith.constant 0 : i32
    %c0_i32_0 = arith.constant 0 : i32
    %c0_i32_1 = arith.constant 0 : i32
    return %c0_i32, %c0_i32_0 : i32, i32
  }
  func.func @transform_2(%arg0: i32) -> (i32, i32) {
    %c0_i32 = arith.constant 0 : i32
    %c0_i32_0 = arith.constant 0 : i32
    %c0_i32_1 = arith.constant 0 : i32
    return %c0_i32, %c0_i32_0 : i32, i32
  }
  func.func @transform_3(%arg0: i32) -> (i32, i32) {
    %c0_i32 = arith.constant 0 : i32
    %c0_i32_0 = arith.constant 0 : i32
    %c0_i32_1 = arith.constant 0 : i32
    return %c0_i32, %c0_i32_0 : i32, i32
  }
  func.func @transform_4(%arg0: i32) -> (i32, i32) {
    %c0_i32 = arith.constant 0 : i32
    %c0_i32_0 = arith.constant 0 : i32
    %c0_i32_1 = arith.constant 0 : i32
    return %c0_i32, %c0_i32_0 : i32, i32
  }
  func.func @transform_5(%arg0: i32) -> (i32, i32) {
    %c0_i32 = arith.constant 0 : i32
    %c0_i32_0 = arith.constant 0 : i32
    %c0_i32_1 = arith.constant 0 : i32
    return %c0_i32, %c0_i32_0 : i32, i32
  }
  func.func @transform_6(%arg0: i32) -> (i32, i32) {
    %c0_i32 = arith.constant 0 : i32
    %c0_i32_0 = arith.constant 0 : i32
    %c0_i32_1 = arith.constant 0 : i32
    return %c0_i32, %c0_i32_0 : i32, i32
  }
  func.func @transform_7(%arg0: i32) -> (i32, i32, i32) {
    %c0_i32 = arith.constant 0 : i32
    %c0_i32_0 = arith.constant 0 : i32
    %c0_i32_1 = arith.constant 0 : i32
    return %arg0, %c0_i32, %c0_i32_0 : i32, i32, i32
  }
}

</mosaic_0001>

<bundles_post_ra>
// kernel: two_class_classifier_forward.1
= control target key start
LH: loop header
LB: loop body
LE: loop exit
PB: predicated region body
PF: predicated region fallthrough
CT: control target
= control target key end

     0   :  { %s3499_s24 = smov 0   ;;  %s5028_s0 = inlined_call_operand.vmem [shape: f32[2,18,18,4], index: 0, kind: input, shape index: {}]   ;;  %s5029_s1 = inlined_call_operand.vmem [shape: f32[36,128], index: 1, kind: input, shape index: {}]   ;;  %s5030_s2 = inlined_call_operand.vmem [shape: f32[1,128], index: 2, kind: input, shape index: {}]   ;;  %s5031_s3 = inlined_call_operand.vmem [shape: f32[128,128], index: 3, kind: input, shape index: {}]   ;;  %s5032_s4 = inlined_call_operand.vmem [shape: f32[1,128], index: 4, kind: input, shape index: {}]   ;;  %s5033_s5 = inlined_call_operand.vmem [shape: f32[128,128], index: 5, kind: input, shape index: {}]   ;;  %s5034_s6 = inlined_call_operand.vmem [shape: f32[1,128], index: 6, kind: input, shape index: {}]   ;;  %s5035_s7 = inlined_call_operand.vmem [shape: f32[2,1,128], index: 7, kind: output, shape index: {}]  }
   0x1 LB: > { %s2939_s25 = sadd.s32 4294967295, %s3456_s24   ;;  %p2943_p0 = scmp.ge.s32.totalorder %s3456_s24, 1  ;;  %s3456_s24 = sphi %s3499_s24, %s17_s24  }
   0x2   : > { %p237_p1 = scmp.lt.s32.totalorder %s3456_s24, 3 }
   0x4   : > { %p238_p2 = pnand %p2943_p0, %p237_p1 }
   0x6   : > { %241 = sbr.rel (%p238_p2) target bundleno = 1166 (0x48e), region = 48 }
   0xb   : > { %v340_v0 = vld [vmem:[%s5029_s1 + $0x4] sm:$0xf]  ;;  %vm438_vm0 = vcmask 1043456   ;;  %p267_p3 = scmp.lt.s32.totalorder %s2939_s25, 1  ;;  %v307_v1 = vld [vmem:[%s5029_s1] sm:$0xf] }
   0xc   : > { %3436 = vmatpush.msk.msra.mxu1 %vm438_vm0, %v340_v0  ;;  %3437 = vmatpush.msk.msra.mxu2 %vm438_vm0, %v340_v0  ;;  %vm341_vm1 = vcmask 31744   ;;  %v799_v22 = vld [vmem:[%s5029_s1 + $0x8] sm:$0xf]  ;;  %v1077_v27 = vld [vmem:[%s5029_s1 + $0xc] sm:$0xf] }
   0xd   : > { %s5209_s25 = smov (!%p267_p3, %s2939_s25), 1  ;;  %2945 = vmatpush.msk.msra.mxu0 %vm438_vm0, %v340_v0  ;;  %3438 = vmatpush.msk.msra.mxu3 %vm438_vm0, %v340_v0  ;;  %v1354_v32 = vld [vmem:[%s5029_s1 + $0x10] sm:$0xf] }
   0xe   : > { %2978 = vmatpush.msk.msrb.mxu1 %vm438_vm0, %v307_v1  ;;  %s3439_s30 = smul.u32 432, %s5209_s25  ;;  %3011 = vmatpush.msk.msrb.mxu2 %vm438_vm0, %v799_v22  ;;  %s274_s13 = scalar_lea.vmem %s5035_s7, %s5209_s25 }
   0xf   : > { %3076 = vmatpush.msk.msrb.mxu3 %vm438_vm0, %v1077_v27  ;;  %3141 = vmatpush.msk.msrb.mxu0 %vm438_vm0, %v1354_v32 }
  0x10   : > { %s3524_s10 = scalar_lea.vmem %s5028_s0, %s3439_s30 }
  0x11   : > { %v3527_v2 = vld [vmem:[%s3524_s10 + $0x79] sm:$0xff]  ;;  %v3530_v3 = vld [vmem:[%s3524_s10 + $0xa9] sm:$0xff]  ;;  %v308_v4 = vld [vmem:[%s3524_s10 + $0x1] sm:$0xff] }
  0x12   : > { %2956 = vmatmul.msk.f32.vlgmr.msra.gmra.mxu1 %vm341_vm1, %v3527_v2  ;;  %2960 = vmatmul.msk.f32.vlgmr.msra.gmra.mxu2 %vm341_vm1, %v3530_v3  ;;  %v3538_v5 = vld [vmem:[%s3524_s10 + $0x111] sm:$0xff]  ;;  %v3544_v6 = vld [vmem:[%s3524_s10 + $0x81] sm:$0xff]  ;;  %v309_v8 = vld [vmem:[%s3524_s10 + $0x9] sm:$0xff] }
  0x13   : > { %2946 = vmatmul.msk.f32.vlgmr.msra.gmra.mxu0 %vm341_vm1, %v308_v4  ;;  %2969 = vmatmul.msk.f32.vlgmr.msra.gmra.mxu3 %vm341_vm1, %v3538_v5  ;;  %v3547_v7 = vld [vmem:[%s3524_s10 + $0xb1] sm:$0xff]  ;;  %v3551_v9 = vld [vmem:[%s3524_s10 + $0x121] sm:$0xff]  ;;  %v3567_v12 = vld [vmem:[%s3524_s10 + $0x19] sm:$0xff] }
  0x14   : > { %v3561_v10 = vld [vmem:[%s3524_s10 + $0x91] sm:$0xff]  ;;  %v3564_v11 = vld [vmem:[%s3524_s10 + $0xc1] sm:$0xff]  ;;  %v3570_v13 = vld [vmem:[%s3524_s10 + $0x129] sm:$0xff] }
  0x15   : > { %v3581_v14 = vld [vmem:[%s3524_s10 + $0x99] sm:$0xff]  ;;  %v3584_v15 = vld [vmem:[%s3524_s10 + $0xc9] sm:$0xff]  ;;  %v3587_v16 = vld [vmem:[%s3524_s10 + $0x21] sm:$0xff] }
  0x16   : > { %v3590_v17 = vld [vmem:[%s3524_s10 + $0x139] sm:$0xff]  ;;  %v3605_v20 = vld [vmem:[%s3524_s10 + $0x31] sm:$0xff]  ;;  %v3608_v21 = vld [vmem:[%s3524_s10 + $0x141] sm:$0xff] }
  0x17   : > { %v3601_v18 = vld [vmem:[%s3524_s10 + $0xd9] sm:$0xff]  ;;  %v3622_v23 = vld [vmem:[%s3524_s10 + $0xe1] sm:$0xff]  ;;  %v3629_v26 = vld [vmem:[%s3524_s10 + $0x151] sm:$0xff] }
  0x18   : > { %v275_v19 = vld [vmem:[%s3524_s10] sm:$0xff]  ;;  %v276_v24 = vld [vmem:[%s3524_s10 + $0x8] sm:$0xff]  ;;  %v3643_v28 = vld [vmem:[%s3524_s10 + $0xf1] sm:$0xff] }
  0x19   : > { %v3626_v25 = vld [vmem:[%s3524_s10 + $0x39] sm:$0xff]  ;;  %v3647_v30 = vld [vmem:[%s3524_s10 + $0x49] sm:$0xff]  ;;  %v3668_v35 = vld [vmem:[%s3524_s10 + $0x51] sm:$0xff] }
  0x1a   : > { %2957 = vmatmul.msk.f32.gmra.mxu1 %vm341_vm1, %v3544_v6  ;;  %2961 = vmatmul.msk.f32.gmra.mxu2 %vm341_vm1, %v3547_v7  ;;  %v277_v29 = vld [vmem:[%s3524_s10 + $0x18] sm:$0xff]  ;;  %5060 = vst [vmem:[#allocation2_spill] sm:$0xff] %v3647_v30  ;;  %v278_v34 = vld [vmem:[%s3524_s10 + $0x20] sm:$0xff]  ;;  %v3671_v36 = vld [vmem:[%s3524_s10 + $0x169] sm:$0xff] }
  0x1b   : > { %2947 = vmatmul.msk.f32.gmra.mxu0 %vm341_vm1, %v309_v8  ;;  %2970 = vmatmul.msk.f32.gmra.mxu3 %vm341_vm1, %v3551_v9  ;;  %v3650_v31 = vld [vmem:[%s3524_s10 + $0x159] sm:$0xff]  ;;  %5061 = vst [vmem:[#allocation3_spill] sm:$0xff] %v3668_v35  ;;  %v3681_v37 = vld [vmem:[%s3524_s10 + $0x109] sm:$0xff]  ;;  %v316_v39 = vld [vmem:[%s3524_s10 + $0x61] sm:$0xff] }
  0x1c   : > { %v3664_v33 = vld [vmem:[%s3524_s10 + $0xf9] sm:$0xff]  ;;  %v3684_v38 = vld [vmem:[%s3524_s10 + $0x30] sm:$0xff]  ;;  %v767_v42 = vld [vmem:[%s3524_s10 + $0x2] sm:$0xff] }
  0x1d   : > { %v3688_v40 = vld [vmem:[%s3524_s10 + $0x171] sm:$0xff]  ;;  %v317_v43 = vld [vmem:[%s3524_s10 + $0x69] sm:$0xff]  ;;  %v3721_v47 = vld [vmem:[%s3524_s10 + $0x1a] sm:$0xff] }
  0x1e   : > { %v3698_v41 = vld [vmem:[%s3524_s10 + $0x38] sm:$0xff]  ;;  %v3708_v44 = vld [vmem:[%s3524_s10 + $0x48] sm:$0xff]  ;;  %v3718_v46 = vld [vmem:[%s3524_s10 + $0x50] sm:$0xff] }
  0x1f   : > { %5062 = vst [vmem:[#allocation4_spill] sm:$0xff] %v3708_v44  ;;  %v768_v45 = vld [vmem:[%s3524_s10 + $0xa] sm:$0xff]  ;;  %v3732_v48 = vld [vmem:[%s3524_s10 + $0x60] sm:$0xff]  ;;  %v3749_v51 = vld [vmem:[%s3524_s10 + $0x32] sm:$0xff] }
  0x20   : > { %5063 = vst [vmem:[#allocation5_spill] sm:$0xff] %v3718_v46  ;;  %v3735_v49 = vld [vmem:[%s3524_s10 + $0x22] sm:$0xff]  ;;  %v3760_v52 = vld [vmem:[%s3524_s10 + $0x78] sm:$0xff]  ;;  %v3777_v55 = vld [vmem:[%s3524_s10 + $0x4a] sm:$0xff] }
  0x21   : > { %5064 = vst [vmem:[#allocation6_spill] sm:$0xff] %v3732_v48  ;;  %v3746_v50 = vld [vmem:[%s3524_s10 + $0x68] sm:$0xff]  ;;  %v3763_v53 = vld [vmem:[%s3524_s10 + $0x3a] sm:$0xff]  ;;  %v3790_v57 = vld [vmem:[%s3524_s10 + $0x90] sm:$0xff] }
  0x22   : > { %2958 = vmatmul.msk.f32.gmra.mxu1 %vm341_vm1, %v3561_v10  ;;  %2962 = vmatmul.msk.f32.gmra.mxu2 %vm341_vm1, %v3564_v11  ;;  %5065 = vst [vmem:[#allocation7_spill] sm:$0xff] %v3746_v50  ;;  %v3774_v54 = vld [vmem:[%s3524_s10 + $0x80] sm:$0xff]  ;;  %v3793_v58 = vld [vmem:[%s3524_s10 + $0x52] sm:$0xff] }
  0x23   : > { %2948 = vmatmul.msk.f32.gmra.mxu0 %vm341_vm1, %v3567_v12  ;;  %2971 = vmatmul.msk.f32.gmra.mxu3 %vm341_vm1, %v3570_v13  ;;  %5066 = vst [vmem:[#allocation8_spill] sm:$0xff] %v3760_v52  ;;  %v3811_v63 = vld [vmem:[%s3524_s10 + $0x98] sm:$0xff]  ;;  %v3814_v0 = vld [vmem:[%s3524_s10 + $0x62] sm:$0xff]  ;;  %v290_v32 = vld [vmem:[%s3524_s10 + $0xb0] sm:$0xff] }
  0x24   : > { %5067 = vst [vmem:[#allocation9_spill] sm:$0xff] %v3774_v54 }
  0x25   : > { %5068 = vst [vmem:[#allocation10_spill] sm:$0xff] %v3790_v57 }
  0x26   : > { %5070 = vst [vmem:[#allocation12_spill] sm:$0xff] %v3811_v63 }
  0x2a   : > { %2959 = vmatmul.msk.f32.gmra.mxu1 %vm341_vm1, %v3581_v14  ;;  %2963 = vmatmul.msk.f32.gmra.mxu2 %vm341_vm1, %v3584_v15 }
  0x2b   : > { %2949 = vmatmul.msk.f32.gmra.mxu0 %vm341_vm1, %v3587_v16  ;;  %2972 = vmatmul.msk.f32.gmra.mxu3 %vm341_vm1, %v3590_v17 }
  0x32   : > { %2964 = vmatmul.msk.f32.gmra.mxu2 %vm341_vm1, %v3601_v18  ;;  %2979 = vmatmul.msk.f32.vlgmr.msrb.gmra.mxu1 %vm341_vm1, %v275_v19  ;;  %v3833_v19 = vld [vmem:[%s3524_s10 + $0x6a] sm:$0xff] }
  0x33   : > { %2950 = vmatmul.msk.f32.gmra.mxu0 %vm341_vm1, %v3605_v20  ;;  %2973 = vmatmul.msk.f32.gmra.mxu3 %vm341_vm1, %v3608_v21 }
  0x3a   : > { %2965 = vmatmul.msk.f32.gmra.mxu2 %vm341_vm1, %v3622_v23  ;;  %2980 = vmatmul.msk.f32.gmra.mxu1 %vm341_vm1, %v276_v24 }
  0x3b   : > { %2951 = vmatmul.msk.f32.gmra.mxu0 %vm341_vm1, %v3626_v25  ;;  %2974 = vmatmul.msk.f32.gmra.mxu3 %vm341_vm1, %v3629_v26 }
  0x42   : > { %2966 = vmatmul.msk.f32.gmra.mxu2 %vm341_vm1, %v3643_v28  ;;  %2981 = vmatmul.msk.f32.gmra.mxu1 %vm341_vm1, %v277_v29 }
  0x43   : > { %2952 = vmatmul.msk.f32.gmra.mxu0 %vm341_vm1, %v3647_v30  ;;  %2975 = vmatmul.msk.f32.gmra.mxu3 %vm341_vm1, %v3650_v31 }
  0x4a   : > { %2967 = vmatmul.msk.f32.gmra.mxu2 %vm341_vm1, %v3664_v33  ;;  %2982 = vmatmul.msk.f32.gmra.mxu1 %vm341_vm1, %v278_v34 }
  0x4b   : > { %2953 = vmatmul.msk.f32.gmra.mxu0 %vm341_vm1, %v3668_v35  ;;  %2976 = vmatmul.msk.f32.gmra.mxu3 %vm341_vm1, %v3671_v36 }
  0x52   : > { %2968 = vmatmul.msk.f32.gmra.mxu2 %vm341_vm1, %v3681_v37  ;;  %2983 = vmatmul.msk.f32.gmra.mxu1 %vm341_vm1, %v3684_v38 }
  0x53   : > { %2954 = vmatmul.msk.f32.gmra.mxu0 %vm341_vm1, %v316_v39  ;;  %2977 = vmatmul.msk.f32.gmra.mxu3 %vm341_vm1, %v3688_v40 }
  0x5a   : > { %2984 = vmatmul.msk.f32.gmra.mxu1 %vm341_vm1, %v3698_v41  ;;  %3012 = vmatmul.msk.f32.vlgmr.msrb.gmra.mxu2 %vm341_vm1, %v767_v42 }
  0x5b   : > { %2955 = vmatmul.msk.f32.gmra.mxu0 %vm341_vm1, %v317_v43  ;;  %3077 = vmatmul.msk.f32.vlgmr.msrb.gmra.mxu3 %vm341_vm1, %v277_v29 }
  0x62   : > { %2985 = vmatmul.msk.f32.gmra.mxu1 %vm341_vm1, %v3708_v44  ;;  %3013 = vmatmul.msk.f32.gmra.mxu2 %vm341_vm1, %v768_v45  ;;  %v291_v45 = vld [vmem:[%s3524_s10 + $0xc0] sm:$0xff] }
  0x63   : > { %3078 = vmatmul.msk.f32.gmra.mxu3 %vm341_vm1, %v278_v34  ;;  %3142 = vmatmul.msk.f32.vlgmr.msrb.gmra.mxu0 %vm341_vm1, %v3567_v12  ;;  %v3852_v34 = vld [vmem:[%s3524_s10 + $0x7a] sm:$0xff] }
  0x64   : > { %5073 = vst [vmem:[#allocation15_spill] sm:$0xff] %v3852_v34 }
  0x6a   : > { %2986 = vmatmul.msk.f32.gmra.mxu1 %vm341_vm1, %v3718_v46  ;;  %3014 = vmatmul.msk.f32.gmra.mxu2 %vm341_vm1, %v3721_v47 }
  0x6b   : > { %3079 = vmatmul.msk.f32.gmra.mxu3 %vm341_vm1, %v3684_v38  ;;  %3143 = vmatmul.msk.f32.gmra.mxu0 %vm341_vm1, %v3587_v16  ;;  %v289_v16 = vld [vmem:[%s3524_s10 + $0xa8] sm:$0xff] }
  0x72   : > { %2987 = vmatmul.msk.f32.gmra.mxu1 %vm341_vm1, %v3732_v48  ;;  %3015 = vmatmul.msk.f32.gmra.mxu2 %vm341_vm1, %v3735_v49 }
  0x73   : > { %3080 = vmatmul.msk.f32.gmra.mxu3 %vm341_vm1, %v3698_v41  ;;  %3144 = vmatmul.msk.f32.gmra.mxu0 %vm341_vm1, %v3605_v20 }
  0x7a   : > { %2988 = vmatmul.msk.f32.gmra.mxu1 %vm341_vm1, %v3746_v50  ;;  %3016 = vmatmul.msk.f32.gmra.mxu2 %vm341_vm1, %v3749_v51 }
  0x7b   : > { %3081 = vmatmul.msk.f32.gmra.mxu3 %vm341_vm1, %v3708_v44  ;;  %3145 = vmatmul.msk.f32.gmra.mxu0 %vm341_vm1, %v3626_v25 }
  0x82   : > { %2989 = vmatmul.msk.f32.gmra.mxu1 %vm341_vm1, %v3760_v52  ;;  %3017 = vmatmul.msk.f32.gmra.mxu2 %vm341_vm1, %v3763_v53 }
  0x83   : > { %3082 = vmatmul.msk.f32.gmra.mxu3 %vm341_vm1, %v3718_v46  ;;  %3146 = vmatmul.msk.f32.gmra.mxu0 %vm341_vm1, %v3647_v30  ;;  %v3973_v30 = vld [vmem:[%s3524_s10 + $0xca] sm:$0xff] }
  0x8a   : > { %2990 = vmatmul.msk.f32.gmra.mxu1 %vm341_vm1, %v3774_v54  ;;  %3018 = vmatmul.msk.f32.gmra.mxu2 %vm341_vm1, %v3777_v55 }
  0x8b   : > { %3083 = vmatmul.msk.f32.gmra.mxu3 %vm341_vm1, %v3732_v48  ;;  %3147 = vmatmul.msk.f32.gmra.mxu0 %vm341_vm1, %v3668_v35  ;;  %v3904_v48 = vld [vmem:[%s3524_s10 + $0x9a] sm:$0xff] }
  0x8c   : > { %5081 = vst [vmem:[#allocation23_spill] sm:$0xff] %v3904_v48 }
  0x8f   : > { %v3787_v56 = vpop.f32.mrf.mxu1 }
  0x90   : > { %v3795_v59 = vpop.f32.mrf.mxu0 }
  0x92   : > { %2991 = vmatmul.msk.f32.gmra.mxu1 %vm341_vm1, %v3790_v57  ;;  %3019 = vmatmul.msk.f32.gmra.mxu2 %vm341_vm1, %v3793_v58 }
  0x93   : > { %3084 = vmatmul.msk.f32.gmra.mxu3 %vm341_vm1, %v3746_v50  ;;  %3148 = vmatmul.msk.f32.gmra.mxu0 %vm341_vm1, %v316_v39  ;;  %v293_v50 = vld [vmem:[%s3524_s10 + $0xd8] sm:$0xff] }
  0x95   : > { %v3804_v60 = vpop.f32.mrf.mxu2 }
  0x96   : > { %v3806_v61 = vpop.f32.mrf.mxu3 }
  0x97   : > { %5069 = vst [vmem:[#allocation11_spill] sm:$0xff] %v3806_v61  ;;  %v3808_v62 = vpop.f32.mrf.mxu1  ;;  %v292_v61 = vld [vmem:[%s3524_s10 + $0xc8] sm:$0xff] }
  0x98   : > { %v3816_v1 = vpop.f32.mrf.mxu0 }
  0x9a   : > { %2992 = vmatmul.msk.f32.gmra.mxu1 %vm341_vm1, %v3811_v63  ;;  %3020 = vmatmul.msk.f32.gmra.mxu2 %vm341_vm1, %v3814_v0 }
  0x9b   : > { %3085 = vmatmul.msk.f32.gmra.mxu3 %vm341_vm1, %v3760_v52  ;;  %3149 = vmatmul.msk.f32.gmra.mxu0 %vm341_vm1, %v317_v43 }
  0x9d   : > { %v3825_v4 = vpop.f32.mrf.mxu2 }
  0x9e   : > { %v3827_v8 = vpop.f32.mrf.mxu3 }
  0x9f   : > { %5071 = vst [vmem:[#allocation13_spill] sm:$0xff] %v3827_v8  ;;  %v3829_v12 = vpop.f32.mrf.mxu1 }
  0xa0   : > { %v3835_v22 = vpop.f32.mrf.mxu0 }
  0xa2   : > { %2993 = vmatmul.msk.f32.gmra.mxu1 %vm341_vm1, %v289_v16  ;;  %3021 = vmatmul.msk.f32.gmra.mxu2 %vm341_vm1, %v3833_v19 }
  0xa3   : > { %3086 = vmatmul.msk.f32.gmra.mxu3 %vm341_vm1, %v3774_v54  ;;  %3150 = vmatmul.msk.f32.gmra.mxu0 %vm341_vm1, %v3527_v2  ;;  %v3886_v54 = vld [vmem:[%s3524_s10 + $0x92] sm:$0xff] }
  0xa4   : > { %5078 = vst [vmem:[#allocation20_spill] sm:$0xff] %v3886_v54 }
  0xa5   : > { %v3844_v24 = vpop.f32.mrf.mxu2 }
  0xa6   : > { %v3846_v27 = vpop.f32.mrf.mxu3 }
  0xa7   : > { %5072 = vst [vmem:[#allocation14_spill] sm:$0xff] %v3846_v27  ;;  %v3848_v29 = vpop.f32.mrf.mxu1  ;;  %v3869_v27 = vld [vmem:[%s3524_s10 + $0x82] sm:$0xff] }
  0xa8   : > { %v3854_v39 = vpop.f32.mrf.mxu0  ;;  %5075 = vst [vmem:[#allocation17_spill] sm:$0xff] %v3869_v27 }
  0xaa   : > { %2994 = vmatmul.msk.f32.gmra.mxu1 %vm341_vm1, %v290_v32  ;;  %3022 = vmatmul.msk.f32.gmra.mxu2 %vm341_vm1, %v3852_v34 }
  0xab   : > { %3087 = vmatmul.msk.f32.gmra.mxu3 %vm341_vm1, %v3790_v57  ;;  %3151 = vmatmul.msk.f32.gmra.mxu0 %vm341_vm1, %v3544_v6 }
  0xad   : > { %v3863_v2 = vpop.f32.mrf.mxu2 }
  0xae   : > { %v3865_v42 = vpop.f32.mrf.mxu3 }
  0xaf   : > { %5074 = vst [vmem:[#allocation16_spill] sm:$0xff] %v3865_v42  ;;  %v671_v43 = vpop.f32.mrf.mxu1 }
  0xb0   : > { %v3871_v8 = vpop.f32.mrf.mxu0 }
  0xb2   : > { %2995 = vmatmul.msk.f32.gmra.mxu1 %vm341_vm1, %v291_v45  ;;  %3023 = vmatmul.msk.f32.gmra.mxu2 %vm341_vm1, %v3869_v27 }
  0xb3   : > { %3088 = vmatmul.msk.f32.gmra.mxu3 %vm341_vm1, %v3811_v63  ;;  %3152 = vmatmul.msk.f32.gmra.mxu0 %vm341_vm1, %v3561_v10 }
  0xb5   : > { %v3880_v6 = vpop.f32.mrf.mxu2 }
  0xb6   : > { %5076 = vst [vmem:[#allocation18_spill] sm:$0xff] %v3880_v6  ;;  %v3882_v42 = vpop.f32.mrf.mxu3  ;;  %v297_v6 = vld [vmem:[%s3524_s10 + $0x108] sm:$0xff] }
  0xb7   : > { %5077 = vst [vmem:[#allocation19_spill] sm:$0xff] %v3882_v42  ;;  %v674_v57 = vpop.f32.mrf.mxu1 }
  0xb8   : > { %v3888_v52 = vpop.f32.mrf.mxu0 }
  0xba   : > { %2996 = vmatmul.msk.f32.gmra.mxu1 %vm341_vm1, %v292_v61  ;;  %3024 = vmatmul.msk.f32.gmra.mxu2 %vm341_vm1, %v3886_v54  ;;  %v294_v54 = vld [vmem:[%s3524_s10 + $0xe0] sm:$0xff] }
  0xbb   : > { %3089 = vmatmul.msk.f32.gmra.mxu3 %vm341_vm1, %v289_v16  ;;  %3153 = vmatmul.msk.f32.gmra.mxu0 %vm341_vm1, %v3581_v14 }
  0xbd   : > { %v3896_v10 = vpop.f32.mrf.mxu2 }
  0xbe   : > { %5079 = vst [vmem:[#allocation21_spill] sm:$0xff] %v3896_v10  ;;  %v3898_v42 = vpop.f32.mrf.mxu3  ;;  %v3922_v10 = vld [vmem:[%s3524_s10 + $0xaa] sm:$0xff] }
  0xbf   : > { %5080 = vst [vmem:[#allocation22_spill] sm:$0xff] %v3898_v42  ;;  %v3900_v63 = vpop.f32.mrf.mxu1 }
  0xc0   : > { %v3906_v27 = vpop.f32.mrf.mxu0  ;;  %5084 = vst [vmem:[#allocation26_spill] sm:$0xff] %v3922_v10 }
  0xc2   : > { %2997 = vmatmul.msk.f32.gmra.mxu1 %vm341_vm1, %v293_v50  ;;  %3025 = vmatmul.msk.f32.gmra.mxu2 %vm341_vm1, %v3904_v48  ;;  %v295_v48 = vld [vmem:[%s3524_s10 + $0xf0] sm:$0xff] }
  0xc3   : > { %3090 = vmatmul.msk.f32.gmra.mxu3 %vm341_vm1, %v290_v32  ;;  %3154 = vmatmul.msk.f32.gmra.mxu0 %vm341_vm1, %v3530_v3 }
  0xc5   : > { %v3914_v14 = vpop.f32.mrf.mxu2 }
  0xc6   : > { %5082 = vst [vmem:[#allocation24_spill] sm:$0xff] %v3914_v14  ;;  %v3916_v16 = vpop.f32.mrf.mxu3  ;;  %v3940_v14 = vld [vmem:[%s3524_s10 + $0xb2] sm:$0xff] }
  0xc7   : > { %5083 = vst [vmem:[#allocation25_spill] sm:$0xff] %v3916_v16  ;;  %v3918_v42 = vpop.f32.mrf.mxu1 }
  0xc8   : > { %v3924_v35 = vpop.f32.mrf.mxu0  ;;  %5087 = vst [vmem:[#allocation29_spill] sm:$0xff] %v3940_v14 }
  0xca   : > { %2998 = vmatmul.msk.f32.gmra.mxu1 %vm341_vm1, %v294_v54  ;;  %3026 = vmatmul.msk.f32.gmra.mxu2 %vm341_vm1, %v3922_v10  ;;  %v296_v10 = vld [vmem:[%s3524_s10 + $0xf8] sm:$0xff] }
  0xcb   : > { %3091 = vmatmul.msk.f32.gmra.mxu3 %vm341_vm1, %v291_v45  ;;  %3155 = vmatmul.msk.f32.gmra.mxu0 %vm341_vm1, %v3547_v7 }
  0xcd   : > { %v3932_v3 = vpop.f32.mrf.mxu2 }
  0xce   : > { %5085 = vst [vmem:[#allocation27_spill] sm:$0xff] %v3932_v3  ;;  %v3934_v32 = vpop.f32.mrf.mxu3  ;;  %v3958_v3 = vld [vmem:[%s3524_s10 + $0xc2] sm:$0xff] }
  0xcf   : > { %5086 = vst [vmem:[#allocation28_spill] sm:$0xff] %v3934_v32  ;;  %v3936_v16 = vpop.f32.mrf.mxu1 }
  0xd0   : > { %v3942_v46 = vpop.f32.mrf.mxu0  ;;  %5090 = vst [vmem:[#allocation32_spill] sm:$0xff] %v3958_v3 }
  0xd2   : > { %2999 = vmatmul.msk.f32.gmra.mxu1 %vm341_vm1, %v295_v48  ;;  %3027 = vmatmul.msk.f32.gmra.mxu2 %vm341_vm1, %v3940_v14 }
  0xd3   : > { %3092 = vmatmul.msk.f32.gmra.mxu3 %vm341_vm1, %v292_v61  ;;  %3156 = vmatmul.msk.f32.gmra.mxu0 %vm341_vm1, %v3564_v11  ;;  %v672_v11 = vadd.f32 %v671_v43, %v3795_v59 }
  0xd5   : > { %v3950_v7 = vpop.f32.mrf.mxu2 }
  0xd6   : > { %5088 = vst [vmem:[#allocation30_spill] sm:$0xff] %v3950_v7  ;;  %v3952_v45 = vpop.f32.mrf.mxu3 }
  0xd7   : > { %5089 = vst [vmem:[#allocation31_spill] sm:$0xff] %v3952_v45  ;;  %v3954_v32 = vpop.f32.mrf.mxu1 }
  0xd8   : > { %v3960_v34 = vpop.f32.mrf.mxu0 }
  0xda   : > { %3000 = vmatmul.msk.f32.gmra.mxu1 %vm341_vm1, %v296_v10  ;;  %3028 = vmatmul.msk.f32.gmra.mxu2 %vm341_vm1, %v3958_v3 }
  0xdb   : > { %3093 = vmatmul.msk.f32.gmra.mxu3 %vm341_vm1, %v293_v50  ;;  %3157 = vmatmul.msk.f32.gmra.mxu0 %vm341_vm1, %v3584_v15  ;;  %v675_v15 = vadd.f32 %v674_v57, %v3816_v1 }
  0xdd   : > { %v916_v61 = vpop.f32.mrf.mxu2 }
  0xde   : > { %v1012_v45 = vadd.f32 %v916_v61, %v672_v11  ;;  %v1194_v14 = vpop.f32.mrf.mxu3  ;;  %v3990_v11 = vld [vmem:[%s3524_s10 + $0xda] sm:$0xff] }
  0xdf   : > { %v3969_v7 = vpop.f32.mrf.mxu1 }
  0xe0   : > { %v3975_v44 = vadd.f32 %v1194_v14, %v1012_v45  ;;  %v3977_v3 = vpop.f32.mrf.mxu0  ;;  %v298_v45 = vld [vmem:[%s3524_s10 + $0x110] sm:$0xff] }
  0xe1   : > { %5091 = vst [vmem:[#allocation33_spill] sm:$0xff] %v3977_v3 }
  0xe2   : > { %3001 = vmatmul.msk.f32.gmra.mxu1 %vm341_vm1, %v297_v6  ;;  %3029 = vmatmul.msk.f32.gmra.mxu2 %vm341_vm1, %v3973_v30 }
  0xe3   : > { %3094 = vmatmul.msk.f32.gmra.mxu3 %vm341_vm1, %v294_v54  ;;  %3158 = vmatmul.msk.f32.gmra.mxu0 %vm341_vm1, %v3601_v18  ;;  %v678_v18 = vadd.f32 %v3900_v63, %v3835_v22 }
  0xe5   : > { %v919_v50 = vpop.f32.mrf.mxu2 }
  0xe6   : > { %v1013_v59 = vadd.f32 %v919_v50, %v675_v15  ;;  %v1197_v43 = vpop.f32.mrf.mxu3  ;;  %v299_v50 = vld [vmem:[%s3524_s10 + $0x120] sm:$0xff] }
  0xe7   : > { %v3986_v14 = vpop.f32.mrf.mxu1 }
  0xe8   : > { %v3992_v61 = vadd.f32 %v1197_v43, %v1013_v59  ;;  %v3994_v3 = vpop.f32.mrf.mxu0  ;;  %v4008_v59 = vld [vmem:[%s3524_s10 + $0xe2] sm:$0xff] }
  0xe9   : > { %5092 = vst [vmem:[#allocation34_spill] sm:$0xff] %v3994_v3 }
  0xea   : > { %3002 = vmatmul.msk.f32.gmra.mxu1 %vm341_vm1, %v298_v45  ;;  %3030 = vmatmul.msk.f32.gmra.mxu2 %vm341_vm1, %v3990_v11 }
  0xeb   : > { %3095 = vmatmul.msk.f32.gmra.mxu3 %vm341_vm1, %v295_v48  ;;  %3159 = vmatmul.msk.f32.gmra.mxu0 %vm341_vm1, %v3622_v23  ;;  %v681_v23 = vadd.f32 %v3918_v42, %v3854_v39 }
  0xed   : > { %v922_v54 = vpop.f32.mrf.mxu2 }
  0xee   : > { %v1014_v57 = vadd.f32 %v922_v54, %v678_v18  ;;  %v1200_v1 = vpop.f32.mrf.mxu3  ;;  %v300_v54 = vld [vmem:[%s3524_s10 + $0x128] sm:$0xff] }
  0xef   : > { %v4004_v15 = vpop.f32.mrf.mxu1 }
  0xf0   : > { %v4010_v43 = vadd.f32 %v1200_v1, %v1014_v57  ;;  %v4012_v3 = vpop.f32.mrf.mxu0  ;;  %v4026_v57 = vld [vmem:[%s3524_s10 + $0xf2] sm:$0xff] }
  0xf1   : > { %5093 = vst [vmem:[#allocation35_spill] sm:$0xff] %v4012_v3 }
  0xf2   : > { %3003 = vmatmul.msk.f32.gmra.mxu1 %vm341_vm1, %v299_v50  ;;  %3031 = vmatmul.msk.f32.gmra.mxu2 %vm341_vm1, %v4008_v59 }
  0xf3   : > { %3096 = vmatmul.msk.f32.gmra.mxu3 %vm341_vm1, %v296_v10  ;;  %3160 = vmatmul.msk.f32.gmra.mxu0 %vm341_vm1, %v3643_v28  ;;  %v684_v28 = vadd.f32 %v3936_v16, %v3871_v8 }
  0xf5   : > { %v925_v48 = vpop.f32.mrf.mxu2 }
  0xf6   : > { %v1015_v63 = vadd.f32 %v925_v48, %v681_v23  ;;  %v1203_v22 = vpop.f32.mrf.mxu3  ;;  %v301_v48 = vld [vmem:[%s3524_s10 + $0x138] sm:$0xff] }
  0xf7   : > { %v4022_v18 = vpop.f32.mrf.mxu1 }
  0xf8   : > { %v4028_v1 = vadd.f32 %v1203_v22, %v1015_v63  ;;  %v4030_v3 = vpop.f32.mrf.mxu0  ;;  %v4044_v63 = vld [vmem:[%s3524_s10 + $0xfa] sm:$0xff] }
  0xf9   : > { %5094 = vst [vmem:[#allocation36_spill] sm:$0xff] %v4030_v3 }
  0xfa   : > { %3004 = vmatmul.msk.f32.gmra.mxu1 %vm341_vm1, %v300_v54  ;;  %3032 = vmatmul.msk.f32.gmra.mxu2 %vm341_vm1, %v4026_v57 }
  0xfb   : > { %3097 = vmatmul.msk.f32.gmra.mxu3 %vm341_vm1, %v297_v6  ;;  %3161 = vmatmul.msk.f32.gmra.mxu0 %vm341_vm1, %v3664_v33  ;;  %v687_v33 = vadd.f32 %v3954_v32, %v3888_v52 }
  0xfd   : > { %v928_v39 = vpop.f32.mrf.mxu2 }
  0xfe   : > { %v1016_v42 = vadd.f32 %v928_v39, %v684_v28  ;;  %v1206_v10 = vpop.f32.mrf.mxu3  ;;  %v302_v39 = vld [vmem:[%s3524_s10 + $0x140] sm:$0xff] }
  0xff   : > { %v4040_v23 = vpop.f32.mrf.mxu1 }
 0x100   : > { %v4046_v22 = vadd.f32 %v1206_v10, %v1016_v42  ;;  %v4048_v3 = vpop.f32.mrf.mxu0  ;;  %v4062_v42 = vld [vmem:[%s3524_s10 + $0x10a] sm:$0xff] }
 0x101   : > { %5095 = vst [vmem:[#allocation37_spill] sm:$0xff] %v4048_v3 }
 0x102   : > { %3005 = vmatmul.msk.f32.gmra.mxu1 %vm341_vm1, %v301_v48  ;;  %3033 = vmatmul.msk.f32.gmra.mxu2 %vm341_vm1, %v4044_v63 }
 0x103   : > { %3098 = vmatmul.msk.f32.gmra.mxu3 %vm341_vm1, %v298_v45  ;;  %3162 = vmatmul.msk.f32.gmra.mxu0 %vm341_vm1, %v3681_v37  ;;  %v690_v37 = vadd.f32 %v3969_v7, %v3906_v27  ;;  %v693_v27 = vadd.f32 %v3986_v14, %v3924_v35  ;;  %v696_v35 = vadd.f32 %v4004_v15, %v3942_v46 }
 0x104   : > { %v699_v15 = vadd.f32 %v4022_v18, %v3960_v34  ;;  %v702_v34 = vadd.f32 %v4040_v23, %v3787_v56 }
 0x105   : > { %v931_v8 = vpop.f32.mrf.mxu2 }
 0x106   : > { %v1017_v6 = vadd.f32 %v931_v8, %v687_v33  ;;  %v1209_v16 = vpop.f32.mrf.mxu3  ;;  %v303_v8 = vld [vmem:[%s3524_s10 + $0x150] sm:$0xff] }
 0x107   : > { %v4058_v28 = vpop.f32.mrf.mxu1 }
 0x108   : > { %v4064_v10 = vadd.f32 %v1209_v16, %v1017_v6  ;;  %v4066_v3 = vpop.f32.mrf.mxu0  ;;  %v4080_v6 = vld [vmem:[%s3524_s10 + $0x112] sm:$0xff] }
 0x109   : > { %5096 = vst [vmem:[#allocation38_spill] sm:$0xff] %v4066_v3 }
 0x10a   : > { %3006 = vmatmul.msk.f32.gmra.mxu1 %vm341_vm1, %v302_v39  ;;  %3034 = vmatmul.msk.f32.gmra.mxu2 %vm341_vm1, %v4062_v42 }
 0x10b   : > { %3099 = vmatmul.msk.f32.gmra.mxu3 %vm341_vm1, %v299_v50  ;;  %3163 = vmatmul.msk.f32.gmra.mxu0 %vm341_vm1, %v3538_v5  ;;  %v1631_v5 = vld [vmem:[%s5029_s1 + $0x14] sm:$0xf] }
 0x10c   : > { %3206 = vmatpush.msk.msra.mxu1 %vm438_vm0, %v1631_v5 }
 0x10d   : > { %v934_v52 = vpop.f32.mrf.mxu2 }
 0x10e   : > { %v1018_v32 = vadd.f32 %v934_v52, %v690_v37  ;;  %v1212_v45 = vpop.f32.mrf.mxu3 }
 0x10f   : > { %v4076_v33 = vpop.f32.mrf.mxu1 }
 0x110   : > { %v4082_v16 = vadd.f32 %v1212_v45, %v1018_v32  ;;  %v4084_v3 = vpop.f32.mrf.mxu0  ;;  %v304_v32 = vld [vmem:[%s3524_s10 + $0x158] sm:$0xff]  ;;  %v4102_v45 = vld [vmem:[%s3524_s10 + $0x122] sm:$0xff] }
 0x111   : > { %5097 = vst [vmem:[#allocation39_spill] sm:$0xff] %v4084_v3 }
 0x112   : > { %3007 = vmatmul.msk.f32.gmra.mxu1 %vm341_vm1, %v303_v8  ;;  %3035 = vmatmul.msk.f32.gmra.mxu2 %vm341_vm1, %v4080_v6 }
 0x113   : > { %3100 = vmatmul.msk.f32.gmra.mxu3 %vm341_vm1, %v300_v54  ;;  %3164 = vmatmul.msk.f32.gmra.mxu0 %vm341_vm1, %v3551_v9  ;;  %v1909_v9 = vld [vmem:[%s5029_s1 + $0x18] sm:$0xf] }
 0x114   : > { %3271 = vmatpush.msk.msra.mxu2 %vm438_vm0, %v1909_v9 }
 0x115   : > { %v937_v7 = vpop.f32.mrf.mxu2 }
 0x116   : > { %v1019_v50 = vadd.f32 %v937_v7, %v693_v27  ;;  %v1215_v37 = vpop.f32.mrf.mxu3  ;;  %v2186_v7 = vld [vmem:[%s5029_s1 + $0x1c] sm:$0xf] }
 0x117   : > { %v4098_v52 = vpop.f32.mrf.mxu1  ;;  %3336 = vmatpush.msk.msra.mxu3 %vm438_vm0, %v2186_v7  ;;  %v306_v7 = vld [vmem:[%s3524_s10 + $0x170] sm:$0xff] }
 0x118   : > { %v4104_v5 = vadd.f32 %v1215_v37, %v1019_v50  ;;  %v4106_v3 = vpop.f32.mrf.mxu0  ;;  %v305_v37 = vld [vmem:[%s3524_s10 + $0x168] sm:$0xff] }
 0x11a   : > { %3008 = vmatmul.msk.f32.gmra.mxu1 %vm341_vm1, %v304_v32  ;;  %3036 = vmatmul.msk.f32.gmra.mxu2 %vm341_vm1, %v4102_v45 }
 0x11b   : > { %3101 = vmatmul.msk.f32.gmra.mxu3 %vm341_vm1, %v301_v48  ;;  %3165 = vmatmul.msk.f32.gmra.mxu0 %vm341_vm1, %v3570_v13  ;;  %v4127_v48 = vld [vmem:[%s3524_s10 + $0x12a] sm:$0xff] }
 0x11d   : > { %v940_v14 = vpop.f32.mrf.mxu2 }
 0x11e   : > { %v1020_v54 = vadd.f32 %v940_v14, %v696_v35  ;;  %v1218_v27 = vpop.f32.mrf.mxu3 }
 0x11f   : > { %v4123_v50 = vpop.f32.mrf.mxu1 }
 0x120   : > { %v4130_v13 = vadd.f32 %v1218_v27, %v1020_v54  ;;  %v4132_v46 = vpop.f32.mrf.mxu0  ;;  %v2463_v54 = vld [vmem:[%s5029_s1 + $0x20] sm:$0xf] }
 0x121   : > { %5098 = vst [vmem:[#allocation40_spill] sm:$0xff] %v4132_v46  ;;  %v4149_v46 = vld [vmem:[%s3524_s10 + $0x13a] sm:$0xff]  ;;  %3401 = vmatpush.msk.msra.mxu0 %vm438_vm0, %v2463_v54 }
 0x122   : > { %3009 = vmatmul.msk.f32.gmra.mxu1 %vm341_vm1, %v305_v37  ;;  %3037 = vmatmul.msk.f32.gmra.mxu2 %vm341_vm1, %v4127_v48 }
 0x123   : > { %3102 = vmatmul.msk.f32.gmra.mxu3 %vm341_vm1, %v302_v39  ;;  %3166 = vmatmul.msk.f32.gmra.mxu0 %vm341_vm1, %v3590_v17 }
 0x125   : > { %v943_v9 = vpop.f32.mrf.mxu2 }
 0x126   : > { %v1021_v35 = vadd.f32 %v943_v9, %v699_v15  ;;  %v1221_v14 = vpop.f32.mrf.mxu3 }
 0x127   : > { %v4145_v27 = vpop.f32.mrf.mxu1 }
 0x128   : > { %v4152_v39 = vadd.f32 %v1221_v14, %v1021_v35  ;;  %v4154_v17 = vpop.f32.mrf.mxu0  ;;  %v4167_v14 = vld [vmem:[%s3524_s10 + $0x142] sm:$0xff] }
 0x129   : > { %5100 = vst [vmem:[#allocation42_spill] sm:$0xff] %v4154_v17 }
 0x12a   : > { %5099 = vst [vmem:[#allocation41_spill] sm:$0xff] %v4152_v39  ;;  %3010 = vmatmul.msk.f32.gmra.mxu1 %vm341_vm1, %v306_v7  ;;  %3038 = vmatmul.msk.f32.gmra.mxu2 %vm341_vm1, %v4149_v46  ;;  %v4253_v39 = vld [vmem:[%s3524_s10 + $0x181] sm:$0xff] }
 0x12b   : > { %3103 = vmatmul.msk.f32.gmra.mxu3 %vm341_vm1, %v303_v8  ;;  %3167 = vmatmul.msk.f32.gmra.mxu0 %vm341_vm1, %v3608_v21  ;;  %v705_v21 = vadd.f32 %v4058_v28, %v3808_v62 }
 0x12d   : > { %v946_v18 = vpop.f32.mrf.mxu2 }
 0x12e   : > { %v1022_v15 = vadd.f32 %v946_v18, %v702_v34  ;;  %v1224_v9 = vpop.f32.mrf.mxu3  ;;  %v4185_v18 = vld [vmem:[%s3524_s10 + $0x152] sm:$0xff] }
 0x12f   : > { %v4164_v35 = vpop.f32.mrf.mxu1 }
 0x130   : > { %v4169_v54 = vadd.f32 %v1224_v9, %v1022_v15  ;;  %v4171_v17 = vpop.f32.mrf.mxu0 }
 0x131   : > { %5102 = vst [vmem:[#allocation44_spill] sm:$0xff] %v4171_v17  ;;  %v4272_v17 = vld [vmem:[%s3524_s10 + $0x189] sm:$0xff] }
 0x132   : > { %5101 = vst [vmem:[#allocation43_spill] sm:$0xff] %v4169_v54  ;;  %3039 = vmatmul.msk.f32.gmra.mxu2 %vm341_vm1, %v4167_v14  ;;  %3207 = vmatmul.msk.f32.vlgmr.msra.gmra.mxu1 %vm341_vm1, %v3721_v47 }
 0x133   : > { %3104 = vmatmul.msk.f32.gmra.mxu3 %vm341_vm1, %v304_v32  ;;  %3168 = vmatmul.msk.f32.gmra.mxu0 %vm341_vm1, %v3629_v26  ;;  %v708_v26 = vadd.f32 %v4076_v33, %v3829_v12 }
 0x135   : > { %v949_v56 = vpop.f32.mrf.mxu2 }
 0x136   : > { %v1023_v23 = vadd.f32 %v949_v56, %v705_v21  ;;  %v1227_v8 = vpop.f32.mrf.mxu3  ;;  %v4203_v21 = vld [vmem:[%s3524_s10 + $0x15a] sm:$0xff] }
 0x137   : > { %v4182_v34 = vpop.f32.mrf.mxu1 }
 0x138   : > { %v4187_v15 = vadd.f32 %v1227_v8, %v1023_v23  ;;  %v4189_v9 = vpop.f32.mrf.mxu0  ;;  %v4221_v8 = vld [vmem:[%s3524_s10 + $0x16a] sm:$0xff] }
 0x139   : > { %5104 = vst [vmem:[#allocation46_spill] sm:$0xff] %v4189_v9  ;;  %v5116_v9 = vld [vmem:[#allocation17_spill] sm:$0xff] }
 0x13a   : > { %5103 = vst [vmem:[#allocation45_spill] sm:$0xff] %v4187_v15  ;;  %3040 = vmatmul.msk.f32.gmra.mxu2 %vm341_vm1, %v4185_v18  ;;  %3208 = vmatmul.msk.f32.gmra.mxu1 %vm341_vm1, %v3735_v49 }
 0x13b   : > { %3105 = vmatmul.msk.f32.gmra.mxu3 %vm341_vm1, %v305_v37  ;;  %3169 = vmatmul.msk.f32.gmra.mxu0 %vm341_vm1, %v3650_v31  ;;  %v711_v31 = vadd.f32 %v4098_v52, %v3848_v29 }
 0x13d   : > { %v952_v47 = vpop.f32.mrf.mxu2 }
 0x13e   : > { %v1024_v62 = vadd.f32 %v952_v47, %v708_v26  ;;  %v1230_v28 = vpop.f32.mrf.mxu3 }
 0x13f   : > { %v4200_v32 = vpop.f32.mrf.mxu1 }
 0x140   : > { %v4205_v56 = vadd.f32 %v1230_v28, %v1024_v62  ;;  %v4207_v49 = vpop.f32.mrf.mxu0 }
 0x141   : > { %5106 = vst [vmem:[#allocation48_spill] sm:$0xff] %v4207_v49  ;;  %v3309_v49 = vld [vmem:[%s3524_s10 + $0x69] sm:$0xff] }
 0x142   : > { %5105 = vst [vmem:[#allocation47_spill] sm:$0xff] %v4205_v56  ;;  %3041 = vmatmul.msk.f32.gmra.mxu2 %vm341_vm1, %v4203_v21  ;;  %3209 = vmatmul.msk.f32.gmra.mxu1 %vm341_vm1, %v3749_v51 }
 0x143   : > { %3106 = vmatmul.msk.f32.gmra.mxu3 %vm341_vm1, %v306_v7  ;;  %3170 = vmatmul.msk.f32.gmra.mxu0 %vm341_vm1, %v3671_v36  ;;  %v4228_v7 = vld [vmem:[%s3524_s10 + $0x180] sm:$0xff]  ;;  %v714_v36 = vadd.f32 %v4123_v50, %v3804_v60 }
 0x145   : > { %v955_v12 = vpop.f32.mrf.mxu2 }
 0x146   : > { %v1025_v33 = vadd.f32 %v955_v12, %v711_v31  ;;  %v1233_v37 = vpop.f32.mrf.mxu3  ;;  %v4243_v31 = vld [vmem:[%s3524_s10 + $0x172] sm:$0xff] }
 0x147   : > { %v4218_v23 = vpop.f32.mrf.mxu1 }
 0x148   : > { %v4223_v26 = vadd.f32 %v1233_v37, %v1025_v33  ;;  %v4225_v47 = vpop.f32.mrf.mxu0  ;;  %v4250_v37 = vld [vmem:[%s3524_s10 + $0x188] sm:$0xff] }
 0x14a   : > { %3042 = vmatmul.msk.f32.gmra.mxu2 %vm341_vm1, %v4221_v8  ;;  %3210 = vmatmul.msk.f32.gmra.mxu1 %vm341_vm1, %v3763_v53 }
 0x14b   : > { %3107 = vmatmul.msk.f32.gmra.mxu3 %vm341_vm1, %v4228_v7  ;;  %3171 = vmatmul.msk.f32.gmra.mxu0 %vm341_vm1, %v3688_v40  ;;  %v717_v40 = vadd.f32 %v4145_v27, %v3825_v4  ;;  %v720_v4 = vadd.f32 %v4164_v35, %v3844_v24 }
 0x14d   : > { %v958_v29 = vpop.f32.mrf.mxu2 }
 0x14e   : > { %v1026_v52 = vadd.f32 %v958_v29, %v714_v36  ;;  %v1236_v62 = vpop.f32.mrf.mxu3 }
 0x14f   : > { %v4240_v28 = vpop.f32.mrf.mxu1 }
 0x150   : > { %v4245_v12 = vadd.f32 %v1236_v62, %v1026_v52  ;;  %v4247_v33 = vpop.f32.mrf.mxu0 }
 0x152   : > { %3043 = vmatmul.msk.f32.gmra.mxu2 %vm341_vm1, %v4243_v31  ;;  %3211 = vmatmul.msk.f32.gmra.mxu1 %vm341_vm1, %v3777_v55 }
 0x153   : > { %3108 = vmatmul.msk.f32.gmra.mxu3 %vm341_vm1, %v4250_v37  ;;  %3172 = vmatmul.msk.f32.gmra.mxu0 %vm341_vm1, %v4253_v39 }
 0x155   : > { %v961_v60 = vpop.f32.mrf.mxu2 }
 0x156   : > { %v1027_v50 = vadd.f32 %v961_v60, %v717_v40  ;;  %v1239_v36 = vpop.f32.mrf.mxu3 }
 0x157   : > { %v4265_v29 = vpop.f32.mrf.mxu1 }
 0x158   : > { %v4267_v52 = vadd.f32 %v1239_v36, %v1027_v50  ;;  %v4269_v62 = vpop.f32.mrf.mxu0 }
 0x159   : > { %5108 = vst [vmem:[#allocation50_spill] sm:$0xff] %v4269_v62 }
 0x15a   : > { %5107 = vst [vmem:[#allocation49_spill] sm:$0xff] %v4267_v52  ;;  %3212 = vmatmul.msk.f32.gmra.mxu1 %vm341_vm1, %v3793_v58  ;;  %3272 = vmatmul.msk.f32.vlgmr.msra.gmra.mxu2 %vm341_vm1, %v3684_v38 }
 0x15b   : > { %3173 = vmatmul.msk.f32.gmra.mxu0 %vm341_vm1, %v4272_v17  ;;  %3337 = vmatmul.msk.f32.vlgmr.msra.gmra.mxu3 %vm341_vm1, %v3605_v20  ;;  %v723_v20 = vadd.f32 %v4182_v34, %v3863_v2 }
 0x15d   : > { %v964_v27 = vpop.f32.mrf.mxu2 }
 0x15e   : > { %v1028_v40 = vadd.f32 %v964_v27, %v720_v4  ;;  %v1242_v60 = vpop.f32.mrf.mxu3 }
 0x15f   : > { %v4284_v50 = vpop.f32.mrf.mxu1 }
 0x160   : > { %v4286_v36 = vadd.f32 %v1242_v60, %v1028_v40  ;;  %v4288_v54 = vpop.f32.mrf.mxu0 }
 0x162   : > { %3213 = vmatmul.msk.f32.gmra.mxu1 %vm341_vm1, %v3814_v0  ;;  %3273 = vmatmul.msk.f32.gmra.mxu2 %vm341_vm1, %v3698_v41  ;;  %v5109_v41 = vld [vmem:[#allocation4_spill] sm:$0xff] }
 0x163   : > { %3338 = vmatmul.msk.f32.gmra.mxu3 %vm341_vm1, %v3626_v25  ;;  %3402 = vmatmul.msk.f32.vlgmr.msra.gmra.mxu0 %vm341_vm1, %v3749_v51  ;;  %v5110_v25 = vld [vmem:[#allocation2_spill] sm:$0xff] }
 0x164   : > { %v5111_v51 = vld [vmem:[#allocation18_spill] sm:$0xff] }
 0x165   : > { %v967_v38 = vpop.f32.mrf.mxu2  ;;  %v726_v2 = vadd.f32 %v4200_v32, %v5111_v51  ;;  %v5115_v32 = vld [vmem:[#allocation21_spill] sm:$0xff] }
 0x166   : > { %v1029_v24 = vadd.f32 %v967_v38, %v723_v20  ;;  %v1245_v35 = vpop.f32.mrf.mxu3  ;;  %v729_v51 = vadd.f32 %v4218_v23, %v5115_v32 }
 0x167   : > { %v4300_v4 = vpop.f32.mrf.mxu1 }
 0x168   : > { %v4302_v27 = vadd.f32 %v1245_v35, %v1029_v24  ;;  %v4304_v40 = vpop.f32.mrf.mxu0 }
 0x16a   : > { %3214 = vmatmul.msk.f32.gmra.mxu1 %vm341_vm1, %v3833_v19  ;;  %3274 = vmatmul.msk.f32.gmra.mxu2 %vm341_vm1, %v5109_v41  ;;  %v5112_v41 = vld [vmem:[#allocation15_spill] sm:$0xff] }
 0x16b   : > { %3339 = vmatmul.msk.f32.gmra.mxu3 %vm341_vm1, %v5110_v25  ;;  %3403 = vmatmul.msk.f32.gmra.mxu0 %vm341_vm1, %v3763_v53  ;;  %v5113_v25 = vld [vmem:[#allocation5_spill] sm:$0xff]  ;;  %v5114_v53 = vld [vmem:[#allocation3_spill] sm:$0xff] }
 0x16d   : > { %v970_v34 = vpop.f32.mrf.mxu2 }
 0x16e   : > { %v1030_v60 = vadd.f32 %v970_v34, %v726_v2  ;;  %v1248_v20 = vpop.f32.mrf.mxu3 }
 0x16f   : > { %v4316_v38 = vpop.f32.mrf.mxu1 }
 0x170   : > { %v4318_v24 = vadd.f32 %v1248_v20, %v1030_v60  ;;  %v4320_v35 = vpop.f32.mrf.mxu0 }
 0x172   : > { %3215 = vmatmul.msk.f32.gmra.mxu1 %vm341_vm1, %v5112_v41  ;;  %3275 = vmatmul.msk.f32.gmra.mxu2 %vm341_vm1, %v5113_v25  ;;  %v3308_v25 = vld [vmem:[%s3524_s10 + $0x61] sm:$0xff] }
 0x173   : > { %3340 = vmatmul.msk.f32.gmra.mxu3 %vm341_vm1, %v5114_v53  ;;  %3404 = vmatmul.msk.f32.gmra.mxu0 %vm341_vm1, %v3777_v55  ;;  %v5117_v53 = vld [vmem:[#allocation6_spill] sm:$0xff]  ;;  %v5118_v55 = vld [vmem:[#allocation24_spill] sm:$0xff] }
 0x174   : > { %v732_v23 = vadd.f32 %v4240_v28, %v5118_v55 }
 0x175   : > { %v973_v2 = vpop.f32.mrf.mxu2 }
 0x176   : > { %v1031_v34 = vadd.f32 %v973_v2, %v729_v51  ;;  %v1251_v60 = vpop.f32.mrf.mxu3 }
 0x177   : > { %v4332_v20 = vpop.f32.mrf.mxu1 }
 0x178   : > { %v4334_v62 = vadd.f32 %v1251_v60, %v1031_v34  ;;  %v4336_v52 = vpop.f32.mrf.mxu0 }
 0x17a   : > { %3216 = vmatmul.msk.f32.gmra.mxu1 %vm341_vm1, %v5116_v9  ;;  %3276 = vmatmul.msk.f32.gmra.mxu2 %vm341_vm1, %v5117_v53  ;;  %v5120_v53 = vld [vmem:[#allocation20_spill] sm:$0xff] }
 0x17b   : > { %3341 = vmatmul.msk.f32.gmra.mxu3 %vm341_vm1, %v3308_v25  ;;  %3405 = vmatmul.msk.f32.gmra.mxu0 %vm341_vm1, %v3793_v58  ;;  %v5121_v25 = vld [vmem:[#allocation7_spill] sm:$0xff] }
 0x17c   : > { %v5122_v58 = vld [vmem:[#allocation27_spill] sm:$0xff] }
 0x17d   : > { %v976_v32 = vpop.f32.mrf.mxu2  ;;  %v735_v28 = vadd.f32 %v4265_v29, %v5122_v58 }
 0x17e   : > { %v1032_v51 = vadd.f32 %v976_v32, %v732_v23  ;;  %v1254_v2 = vpop.f32.mrf.mxu3 }
 0x17f   : > { %v4348_v34 = vpop.f32.mrf.mxu1 }
 0x180   : > { %v4350_v60 = vadd.f32 %v1254_v2, %v1032_v51  ;;  %v4352_v15 = vpop.f32.mrf.mxu0 }
 0x181   : > { %5119 = vst [vmem:[#allocation4_spill] sm:$0xff] %v4352_v15  ;;  %v3310_v15 = vld [vmem:[%s3524_s10 + $0x79] sm:$0xff] }
 0x182   : > { %3217 = vmatmul.msk.f32.gmra.mxu1 %vm341_vm1, %v5120_v53  ;;  %3277 = vmatmul.msk.f32.gmra.mxu2 %vm341_vm1, %v5121_v25  ;;  %v5125_v25 = vld [vmem:[#allocation23_spill] sm:$0xff] }
 0x183   : > { %3342 = vmatmul.msk.f32.gmra.mxu3 %vm341_vm1, %v3309_v49  ;;  %3406 = vmatmul.msk.f32.gmra.mxu0 %vm341_vm1, %v3814_v0  ;;  %v5126_v49 = vld [vmem:[#allocation8_spill] sm:$0xff]  ;;  %v5127_v0 = vld [vmem:[#allocation30_spill] sm:$0xff] }
 0x184   : > { %v738_v29 = vadd.f32 %v4284_v50, %v5127_v0 }
 0x185   : > { %v979_v55 = vpop.f32.mrf.mxu2 }
 0x186   : > { %v1033_v23 = vadd.f32 %v979_v55, %v735_v28  ;;  %v1257_v32 = vpop.f32.mrf.mxu3 }
 0x187   : > { %v4364_v51 = vpop.f32.mrf.mxu1 }
 0x188   : > { %v4366_v2 = vadd.f32 %v1257_v32, %v1033_v23  ;;  %v4368_v56 = vpop.f32.mrf.mxu0 }
 0x189   : > { %5124 = vst [vmem:[#allocation18_spill] sm:$0xff] %v4368_v56 }
 0x18a   : > { %5123 = vst [vmem:[#allocation2_spill] sm:$0xff] %v4366_v2  ;;  %3218 = vmatmul.msk.f32.gmra.mxu1 %vm341_vm1, %v5125_v25  ;;  %3278 = vmatmul.msk.f32.gmra.mxu2 %vm341_vm1, %v5126_v49  ;;  %v3311_v2 = vld [vmem:[%s3524_s10 + $0x81] sm:$0xff] }
 0x18b   : > { %3343 = vmatmul.msk.f32.gmra.mxu3 %vm341_vm1, %v3310_v15  ;;  %3407 = vmatmul.msk.f32.gmra.mxu0 %vm341_vm1, %v3833_v19  ;;  %v5130_v49 = vld [vmem:[#allocation26_spill] sm:$0xff]  ;;  %v5131_v15 = vld [vmem:[#allocation9_spill] sm:$0xff]  ;;  %v5132_v19 = vld [vmem:[#allocation11_spill] sm:$0xff] }
 0x18c   : > { %v741_v50 = vadd.f32 %v4300_v4, %v5132_v19  ;;  %v5137_v4 = vld [vmem:[#allocation13_spill] sm:$0xff] }
 0x18d   : > { %v982_v58 = vpop.f32.mrf.mxu2 }
 0x18e   : > { %v1034_v28 = vadd.f32 %v982_v58, %v738_v29  ;;  %v1260_v55 = vpop.f32.mrf.mxu3 }
 0x18f   : > { %v4380_v23 = vpop.f32.mrf.mxu1 }
 0x190   : > { %v4382_v32 = vadd.f32 %v1260_v55, %v1034_v28  ;;  %v4384_v56 = vpop.f32.mrf.mxu0 }
 0x191   : > { %5129 = vst [vmem:[#allocation5_spill] sm:$0xff] %v4384_v56 }
 0x192   : > { %5128 = vst [vmem:[#allocation15_spill] sm:$0xff] %v4382_v32  ;;  %3219 = vmatmul.msk.f32.gmra.mxu1 %vm341_vm1, %v5130_v49  ;;  %3279 = vmatmul.msk.f32.gmra.mxu2 %vm341_vm1, %v5131_v15  ;;  %v3312_v32 = vld [vmem:[%s3524_s10 + $0x91] sm:$0xff] }
 0x193   : > { %3344 = vmatmul.msk.f32.gmra.mxu3 %vm341_vm1, %v3311_v2  ;;  %3408 = vmatmul.msk.f32.gmra.mxu0 %vm341_vm1, %v5112_v41  ;;  %v5135_v15 = vld [vmem:[#allocation29_spill] sm:$0xff]  ;;  %v5136_v2 = vld [vmem:[#allocation10_spill] sm:$0xff]  ;;  %v744_v41 = vadd.f32 %v4316_v38, %v5137_v4 }
 0x195   : > { %v985_v0 = vpop.f32.mrf.mxu2 }
 0x196   : > { %v1035_v29 = vadd.f32 %v985_v0, %v741_v50  ;;  %v1263_v58 = vpop.f32.mrf.mxu3 }
 0x197   : > { %v4396_v28 = vpop.f32.mrf.mxu1 }
 0x198   : > { %v4398_v55 = vadd.f32 %v1263_v58, %v1035_v29  ;;  %v4400_v56 = vpop.f32.mrf.mxu0 }
 0x199   : > { %5134 = vst [vmem:[#allocation21_spill] sm:$0xff] %v4400_v56 }
 0x19a   : > { %5133 = vst [vmem:[#allocation3_spill] sm:$0xff] %v4398_v55  ;;  %3220 = vmatmul.msk.f32.gmra.mxu1 %vm341_vm1, %v5135_v15  ;;  %3280 = vmatmul.msk.f32.gmra.mxu2 %vm341_vm1, %v5136_v2  ;;  %v3313_v2 = vld [vmem:[%s3524_s10 + $0x99] sm:$0xff]  ;;  %v5140_v55 = vld [vmem:[#allocation32_spill] sm:$0xff] }
 0x19b   : > { %3345 = vmatmul.msk.f32.gmra.mxu3 %vm341_vm1, %v3312_v32  ;;  %3409 = vmatmul.msk.f32.gmra.mxu0 %vm341_vm1, %v5116_v9  ;;  %v5141_v32 = vld [vmem:[#allocation12_spill] sm:$0xff]  ;;  %v5142_v9 = vld [vmem:[#allocation14_spill] sm:$0xff] }
 0x19c   : > { %v747_v38 = vadd.f32 %v4332_v20, %v5142_v9  ;;  %v5145_v20 = vld [vmem:[#allocation16_spill] sm:$0xff] }
 0x19d   : > { %v988_v19 = vpop.f32.mrf.mxu2 }
 0x19e   : > { %v1036_v50 = vadd.f32 %v988_v19, %v744_v41  ;;  %v1266_v0 = vpop.f32.mrf.mxu3 }
 0x19f   : > { %v4412_v29 = vpop.f32.mrf.mxu1 }
 0x1a0   : > { %v4414_v58 = vadd.f32 %v1266_v0, %v1036_v50  ;;  %v4416_v56 = vpop.f32.mrf.mxu0  ;;  %v3249_v0 = vld [vmem:[%s3524_s10 + $0xa8] sm:$0xff] }
 0x1a1   : > { %5139 = vst [vmem:[#allocation6_spill] sm:$0xff] %v4416_v56 }
 0x1a2   : > { %5138 = vst [vmem:[#allocation17_spill] sm:$0xff] %v4414_v58  ;;  %3221 = vmatmul.msk.f32.gmra.mxu1 %vm341_vm1, %v5140_v55  ;;  %3281 = vmatmul.msk.f32.gmra.mxu2 %vm341_vm1, %v5141_v32  ;;  %v3314_v32 = vld [vmem:[%s3524_s10 + $0xa9] sm:$0xff] }
 0x1a3   : > { %3346 = vmatmul.msk.f32.gmra.mxu3 %vm341_vm1, %v3313_v2  ;;  %3410 = vmatmul.msk.f32.gmra.mxu0 %vm341_vm1, %v5120_v53  ;;  %v750_v53 = vadd.f32 %v4348_v34, %v5145_v20  ;;  %v5148_v34 = vld [vmem:[#allocation19_spill] sm:$0xff] }
 0x1a5   : > { %v991_v4 = vpop.f32.mrf.mxu2 }
 0x1a6   : > { %v1037_v41 = vadd.f32 %v991_v4, %v747_v38  ;;  %v1269_v19 = vpop.f32.mrf.mxu3 }
 0x1a7   : > { %v4428_v50 = vpop.f32.mrf.mxu1 }
 0x1a8   : > { %v4431_v56 = vadd.f32 %v1269_v19, %v1037_v41  ;;  %v4433_v58 = vpop.f32.mrf.mxu0  ;;  %v3250_v41 = vld [vmem:[%s3524_s10 + $0xb0] sm:$0xff] }
 0x1a9   : > { %5144 = vst [vmem:[#allocation20_spill] sm:$0xff] %v4433_v58 }
 0x1aa   : > { %5143 = vst [vmem:[#allocation24_spill] sm:$0xff] %v4431_v56  ;;  %3222 = vmatmul.msk.f32.gmra.mxu1 %vm341_vm1, %v3973_v30  ;;  %3282 = vmatmul.msk.f32.gmra.mxu2 %vm341_vm1, %v3249_v0  ;;  %v3315_v0 = vld [vmem:[%s3524_s10 + $0xb1] sm:$0xff] }
 0x1ab   : > { %3347 = vmatmul.msk.f32.gmra.mxu3 %vm341_vm1, %v3314_v32  ;;  %3411 = vmatmul.msk.f32.gmra.mxu0 %vm341_vm1, %v5125_v25  ;;  %v753_v25 = vadd.f32 %v4364_v51, %v5148_v34  ;;  %v5151_v51 = vld [vmem:[#allocation22_spill] sm:$0xff] }
 0x1ad   : > { %v994_v2 = vpop.f32.mrf.mxu2 }
 0x1ae   : > { %v1038_v9 = vadd.f32 %v994_v2, %v750_v53  ;;  %v1272_v38 = vpop.f32.mrf.mxu3 }
 0x1af   : > { %v4444_v4 = vpop.f32.mrf.mxu1 }
 0x1b0   : > { %v4447_v19 = vadd.f32 %v1272_v38, %v1038_v9  ;;  %v4449_v58 = vpop.f32.mrf.mxu0  ;;  %v3251_v9 = vld [vmem:[%s3524_s10 + $0xc0] sm:$0xff] }
 0x1b1   : > { %5147 = vst [vmem:[#allocation27_spill] sm:$0xff] %v4449_v58 }
 0x1b2   : > { %5146 = vst [vmem:[#allocation7_spill] sm:$0xff] %v4447_v19  ;;  %3223 = vmatmul.msk.f32.gmra.mxu1 %vm341_vm1, %v3990_v11  ;;  %3283 = vmatmul.msk.f32.gmra.mxu2 %vm341_vm1, %v3250_v41  ;;  %v3316_v41 = vld [vmem:[%s3524_s10 + $0xc1] sm:$0xff] }
 0x1b3   : > { %3348 = vmatmul.msk.f32.gmra.mxu3 %vm341_vm1, %v3315_v0  ;;  %3412 = vmatmul.msk.f32.gmra.mxu0 %vm341_vm1, %v5130_v49  ;;  %v756_v49 = vadd.f32 %v4380_v23, %v5151_v51  ;;  %v5154_v23 = vld [vmem:[#allocation25_spill] sm:$0xff] }
 0x1b5   : > { %v997_v32 = vpop.f32.mrf.mxu2 }
 0x1b6   : > { %v1039_v20 = vadd.f32 %v997_v32, %v753_v25  ;;  %v1275_v53 = vpop.f32.mrf.mxu3 }
 0x1b7   : > { %v4460_v2 = vpop.f32.mrf.mxu1 }
 0x1b8   : > { %v4463_v38 = vadd.f32 %v1275_v53, %v1039_v20  ;;  %v4465_v56 = vpop.f32.mrf.mxu0  ;;  %v3252_v20 = vld [vmem:[%s3524_s10 + $0xc8] sm:$0xff] }
 0x1b9   : > { %5150 = vst [vmem:[#allocation8_spill] sm:$0xff] %v4465_v56 }
 0x1ba   : > { %5149 = vst [vmem:[#allocation23_spill] sm:$0xff] %v4463_v38  ;;  %3224 = vmatmul.msk.f32.gmra.mxu1 %vm341_vm1, %v4008_v59  ;;  %3284 = vmatmul.msk.f32.gmra.mxu2 %vm341_vm1, %v3251_v9  ;;  %v3317_v9 = vld [vmem:[%s3524_s10 + $0xc9] sm:$0xff] }
 0x1bb   : > { %3349 = vmatmul.msk.f32.gmra.mxu3 %vm341_vm1, %v3316_v41  ;;  %3413 = vmatmul.msk.f32.gmra.mxu0 %vm341_vm1, %v5135_v15  ;;  %v759_v15 = vadd.f32 %v4396_v28, %v5154_v23  ;;  %v5157_v28 = vld [vmem:[#allocation28_spill] sm:$0xff] }
 0x1bd   : > { %v1000_v0 = vpop.f32.mrf.mxu2 }
 0x1be   : > { %v1040_v34 = vadd.f32 %v1000_v0, %v756_v49  ;;  %v1278_v25 = vpop.f32.mrf.mxu3 }
 0x1bf   : > { %v4476_v32 = vpop.f32.mrf.mxu1 }
 0x1c0   : > { %v4479_v53 = vadd.f32 %v1278_v25, %v1040_v34  ;;  %v4481_v58 = vpop.f32.mrf.mxu0  ;;  %v3253_v34 = vld [vmem:[%s3524_s10 + $0xd8] sm:$0xff] }
 0x1c1   : > { %5153 = vst [vmem:[#allocation26_spill] sm:$0xff] %v4481_v58 }
 0x1c2   : > { %5152 = vst [vmem:[#allocation30_spill] sm:$0xff] %v4479_v53  ;;  %3225 = vmatmul.msk.f32.gmra.mxu1 %vm341_vm1, %v4026_v57  ;;  %3285 = vmatmul.msk.f32.gmra.mxu2 %vm341_vm1, %v3252_v20  ;;  %v3318_v20 = vld [vmem:[%s3524_s10 + $0xd9] sm:$0xff]  ;;  %v5174_v53 = vld [vmem:[#allocation47_spill] sm:$0xff] }
 0x1c3   : > { %3350 = vmatmul.msk.f32.gmra.mxu3 %vm341_vm1, %v3317_v9  ;;  %3414 = vmatmul.msk.f32.gmra.mxu0 %vm341_vm1, %v5140_v55  ;;  %v762_v55 = vadd.f32 %v4412_v29, %v5157_v28 }
 0x1c5   : > { %v1003_v41 = vpop.f32.mrf.mxu2 }
 0x1c6   : > { %v1041_v51 = vadd.f32 %v1003_v41, %v759_v15  ;;  %v1281_v49 = vpop.f32.mrf.mxu3 }
 0x1c7   : > { %v4492_v0 = vpop.f32.mrf.mxu1 }
 0x1c8   : > { %v4495_v25 = vadd.f32 %v1281_v49, %v1041_v51  ;;  %v4497_v19 = vpop.f32.mrf.mxu0  ;;  %v3254_v51 = vld [vmem:[%s3524_s10 + $0xe0] sm:$0xff] }
 0x1c9   : > { %5156 = vst [vmem:[#allocation11_spill] sm:$0xff] %v4497_v19 }
 0x1ca   : > { %5155 = vst [vmem:[#allocation9_spill] sm:$0xff] %v4495_v25  ;;  %3226 = vmatmul.msk.f32.gmra.mxu1 %vm341_vm1, %v4044_v63  ;;  %3286 = vmatmul.msk.f32.gmra.mxu2 %vm341_vm1, %v3253_v34  ;;  %v3319_v34 = vld [vmem:[%s3524_s10 + $0xe1] sm:$0xff] }
 0x1cb   : > { %3351 = vmatmul.msk.f32.gmra.mxu3 %vm341_vm1, %v3318_v20  ;;  %3415 = vmatmul.msk.f32.gmra.mxu0 %vm341_vm1, %v3973_v30  ;;  %v5160_v30 = vld [vmem:[#allocation31_spill] sm:$0xff] }
 0x1cc   : > { %v765_v29 = vadd.f32 %v4428_v50, %v5160_v30 }
 0x1cd   : > { %v1006_v9 = vpop.f32.mrf.mxu2 }
 0x1ce   : > { %v1042_v23 = vadd.f32 %v1006_v9, %v762_v55  ;;  %v1284_v15 = vpop.f32.mrf.mxu3 }
 0x1cf   : > { %v4508_v41 = vpop.f32.mrf.mxu1 }
 0x1d0   : > { %v4511_v49 = vadd.f32 %v1284_v15, %v1042_v23  ;;  %v4513_v56 = vpop.f32.mrf.mxu0  ;;  %v3255_v23 = vld [vmem:[%s3524_s10 + $0xf0] sm:$0xff] }
 0x1d1   : > { %5159 = vst [vmem:[#allocation10_spill] sm:$0xff] %v4513_v56 }
 0x1d2   : > { %5158 = vst [vmem:[#allocation29_spill] sm:$0xff] %v4511_v49  ;;  %3227 = vmatmul.msk.f32.gmra.mxu1 %vm341_vm1, %v4062_v42  ;;  %3287 = vmatmul.msk.f32.gmra.mxu2 %vm341_vm1, %v3254_v51  ;;  %v3320_v51 = vld [vmem:[%s3524_s10 + $0xf1] sm:$0xff]  ;;  %v3399_v49 = vld [vmem:[%s3524_s10 + $0x19a] sm:$0xff] }
 0x1d3   : > { %3352 = vmatmul.msk.f32.gmra.mxu3 %vm341_vm1, %v3319_v34  ;;  %3416 = vmatmul.msk.f32.gmra.mxu0 %vm341_vm1, %v3990_v11  ;;  %v5163_v34 = vld [vmem:[#allocation33_spill] sm:$0xff] }
 0x1d4   : > { %v1567_v58 = vadd.f32 %v5163_v34, %v3975_v44 }
 0x1d5   : > { %v1009_v20 = vpop.f32.mrf.mxu2 }
 0x1d6   : > { %v1043_v28 = vadd.f32 %v1009_v20, %v765_v29  ;;  %v1287_v55 = vpop.f32.mrf.mxu3  ;;  %v1844_v11 = vadd.f32 %v4444_v4, %v1567_v58 }
 0x1d7   : > { %v4524_v9 = vpop.f32.mrf.mxu1 }
 0x1d8   : > { %v4527_v15 = vadd.f32 %v1287_v55, %v1043_v28  ;;  %v4529_v38 = vpop.f32.mrf.mxu0  ;;  %v3256_v28 = vld [vmem:[%s3524_s10 + $0xf8] sm:$0xff] }
 0x1d9   : > { %5162 = vst [vmem:[#allocation32_spill] sm:$0xff] %v4529_v38 }
 0x1da   : > { %5161 = vst [vmem:[#allocation13_spill] sm:$0xff] %v4527_v15  ;;  %3228 = vmatmul.msk.f32.gmra.mxu1 %vm341_vm1, %v4080_v6  ;;  %3288 = vmatmul.msk.f32.gmra.mxu2 %vm341_vm1, %v3255_v23  ;;  %v3321_v23 = vld [vmem:[%s3524_s10 + $0xf9] sm:$0xff]  ;;  %v3331_v15 = vld [vmem:[%s3524_s10 + $0x171] sm:$0xff] }
 0x1db   : > { %3353 = vmatmul.msk.f32.gmra.mxu3 %vm341_vm1, %v3320_v51  ;;  %3417 = vmatmul.msk.f32.gmra.mxu0 %vm341_vm1, %v4008_v59  ;;  %v5165_v51 = vld [vmem:[#allocation34_spill] sm:$0xff] }
 0x1dc   : > { %v1568_v34 = vadd.f32 %v5165_v51, %v3992_v61 }
 0x1dd   : > { %v2026_v50 = vpop.f32.mrf.mxu2 }
 0x1de   : > { %v2122_v30 = vadd.f32 %v2026_v50, %v1844_v11  ;;  %v2303_v29 = vpop.f32.mrf.mxu3  ;;  %v1845_v59 = vadd.f32 %v4460_v2, %v1568_v34 }
 0x1df   : > { %v4541_v20 = vpop.f32.mrf.mxu1 }
 0x1e0   : > { %v4544_v44 = vadd.f32 %v2303_v29, %v2122_v30  ;;  %v4546_v55 = vpop.f32.mrf.mxu0  ;;  %v3257_v30 = vld [vmem:[%s3524_s10 + $0x108] sm:$0xff] }
 0x1e1   : > { %5164 = vst [vmem:[#allocation12_spill] sm:$0xff] %v4546_v55 }
 0x1e2   : > { %3229 = vmatmul.msk.f32.gmra.mxu1 %vm341_vm1, %v4102_v45  ;;  %3289 = vmatmul.msk.f32.gmra.mxu2 %vm341_vm1, %v3256_v28  ;;  %v3322_v28 = vld [vmem:[%s3524_s10 + $0x109] sm:$0xff] }
 0x1e3   : > { %3354 = vmatmul.msk.f32.gmra.mxu3 %vm341_vm1, %v3321_v23  ;;  %3418 = vmatmul.msk.f32.gmra.mxu0 %vm341_vm1, %v4026_v57  ;;  %v5166_v23 = vld [vmem:[#allocation35_spill] sm:$0xff] }
 0x1e4   : > { %v1569_v51 = vadd.f32 %v5166_v23, %v4010_v43 }
 0x1e5   : > { %v2029_v58 = vpop.f32.mrf.mxu2 }
 0x1e6   : > { %v2123_v4 = vadd.f32 %v2029_v58, %v1845_v59  ;;  %v2306_v11 = vpop.f32.mrf.mxu3  ;;  %v1846_v57 = vadd.f32 %v4476_v32, %v1569_v51 }
 0x1e7   : > { %v4558_v50 = vpop.f32.mrf.mxu1 }
 0x1e8   : > { %v4561_v61 = vadd.f32 %v2306_v11, %v2123_v4  ;;  %v4563_v29 = vpop.f32.mrf.mxu0  ;;  %v3258_v4 = vld [vmem:[%s3524_s10 + $0x110] sm:$0xff] }
 0x1ea   : > { %3230 = vmatmul.msk.f32.gmra.mxu1 %vm341_vm1, %v4127_v48  ;;  %3290 = vmatmul.msk.f32.gmra.mxu2 %vm341_vm1, %v3257_v30  ;;  %v3323_v30 = vld [vmem:[%s3524_s10 + $0x111] sm:$0xff] }
 0x1eb   : > { %3355 = vmatmul.msk.f32.gmra.mxu3 %vm341_vm1, %v3322_v28  ;;  %3419 = vmatmul.msk.f32.gmra.mxu0 %vm341_vm1, %v4044_v63  ;;  %v5167_v28 = vld [vmem:[#allocation36_spill] sm:$0xff] }
 0x1ec   : > { %v1570_v23 = vadd.f32 %v5167_v28, %v4028_v1 }
 0x1ed   : > { %v2032_v2 = vpop.f32.mrf.mxu2 }
 0x1ee   : > { %v2124_v34 = vadd.f32 %v2032_v2, %v1846_v57  ;;  %v2309_v59 = vpop.f32.mrf.mxu3  ;;  %v1847_v63 = vadd.f32 %v4492_v0, %v1570_v23 }
 0x1ef   : > { %v4575_v58 = vpop.f32.mrf.mxu1 }
 0x1f0   : > { %v4578_v43 = vadd.f32 %v2309_v59, %v2124_v34  ;;  %v4580_v11 = vpop.f32.mrf.mxu0  ;;  %v3259_v34 = vld [vmem:[%s3524_s10 + $0x120] sm:$0xff] }
 0x1f2   : > { %3231 = vmatmul.msk.f32.gmra.mxu1 %vm341_vm1, %v4149_v46  ;;  %3291 = vmatmul.msk.f32.gmra.mxu2 %vm341_vm1, %v3258_v4  ;;  %v3324_v4 = vld [vmem:[%s3524_s10 + $0x121] sm:$0xff] }
 0x1f3   : > { %3356 = vmatmul.msk.f32.gmra.mxu3 %vm341_vm1, %v3323_v30  ;;  %3420 = vmatmul.msk.f32.gmra.mxu0 %vm341_vm1, %v4062_v42  ;;  %v5168_v30 = vld [vmem:[#allocation37_spill] sm:$0xff] }
 0x1f4   : > { %v1571_v28 = vadd.f32 %v5168_v30, %v4046_v22 }
 0x1f5   : > { %v2035_v32 = vpop.f32.mrf.mxu2 }
 0x1f6   : > { %v2125_v51 = vadd.f32 %v2035_v32, %v1847_v63  ;;  %v2312_v57 = vpop.f32.mrf.mxu3  ;;  %v1848_v42 = vadd.f32 %v4508_v41, %v1571_v28 }
 0x1f7   : > { %v4592_v2 = vpop.f32.mrf.mxu1 }
 0x1f8   : > { %v4595_v1 = vadd.f32 %v2312_v57, %v2125_v51  ;;  %v4597_v59 = vpop.f32.mrf.mxu0  ;;  %v3260_v51 = vld [vmem:[%s3524_s10 + $0x128] sm:$0xff] }
 0x1fa   : > { %3232 = vmatmul.msk.f32.gmra.mxu1 %vm341_vm1, %v4167_v14  ;;  %3292 = vmatmul.msk.f32.gmra.mxu2 %vm341_vm1, %v3259_v34  ;;  %v3325_v34 = vld [vmem:[%s3524_s10 + $0x129] sm:$0xff] }
 0x1fb   : > { %3357 = vmatmul.msk.f32.gmra.mxu3 %vm341_vm1, %v3324_v4  ;;  %3421 = vmatmul.msk.f32.gmra.mxu0 %vm341_vm1, %v4080_v6  ;;  %v5169_v4 = vld [vmem:[#allocation38_spill] sm:$0xff] }
 0x1fc   : > { %v1572_v30 = vadd.f32 %v5169_v4, %v4064_v10 }
 0x1fd   : > { %v2038_v0 = vpop.f32.mrf.mxu2 }
 0x1fe   : > { %v2126_v23 = vadd.f32 %v2038_v0, %v1848_v42  ;;  %v2315_v63 = vpop.f32.mrf.mxu3  ;;  %v1849_v6 = vadd.f32 %v4524_v9, %v1572_v30 }
 0x1ff   : > { %v4609_v32 = vpop.f32.mrf.mxu1 }
 0x200   : > { %v4612_v22 = vadd.f32 %v2315_v63, %v2126_v23  ;;  %v4614_v57 = vpop.f32.mrf.mxu0  ;;  %v3261_v23 = vld [vmem:[%s3524_s10 + $0x138] sm:$0xff] }
 0x202   : > { %3233 = vmatmul.msk.f32.gmra.mxu1 %vm341_vm1, %v4185_v18  ;;  %3293 = vmatmul.msk.f32.gmra.mxu2 %vm341_vm1, %v3260_v51  ;;  %v3326_v51 = vld [vmem:[%s3524_s10 + $0x139] sm:$0xff] }
 0x203   : > { %3358 = vmatmul.msk.f32.gmra.mxu3 %vm341_vm1, %v3325_v34  ;;  %3422 = vmatmul.msk.f32.gmra.mxu0 %vm341_vm1, %v4102_v45  ;;  %v5170_v34 = vld [vmem:[#allocation39_spill] sm:$0xff] }
 0x204   : > { %v1573_v4 = vadd.f32 %v5170_v34, %v4082_v16 }
 0x205   : > { %v2041_v41 = vpop.f32.mrf.mxu2 }
 0x206   : > { %v2127_v28 = vadd.f32 %v2041_v41, %v1849_v6  ;;  %v2318_v42 = vpop.f32.mrf.mxu3  ;;  %v1850_v45 = vadd.f32 %v4541_v20, %v1573_v4 }
 0x207   : > { %v4626_v0 = vpop.f32.mrf.mxu1 }
 0x208   : > { %v4629_v10 = vadd.f32 %v2318_v42, %v2127_v28  ;;  %v4631_v63 = vpop.f32.mrf.mxu0  ;;  %v3262_v28 = vld [vmem:[%s3524_s10 + $0x140] sm:$0xff] }
 0x20a   : > { %3234 = vmatmul.msk.f32.gmra.mxu1 %vm341_vm1, %v4203_v21  ;;  %3294 = vmatmul.msk.f32.gmra.mxu2 %vm341_vm1, %v3261_v23  ;;  %v3327_v23 = vld [vmem:[%s3524_s10 + $0x141] sm:$0xff] }
 0x20b   : > { %3359 = vmatmul.msk.f32.gmra.mxu3 %vm341_vm1, %v3326_v51  ;;  %3423 = vmatmul.msk.f32.gmra.mxu0 %vm341_vm1, %v4127_v48  ;;  %v1574_v51 = vadd.f32 %v4106_v3, %v4104_v5  ;;  %v3263_v3 = vld [vmem:[%s3524_s10 + $0x150] sm:$0xff] }
 0x20d   : > { %v2044_v9 = vpop.f32.mrf.mxu2  ;;  %v1851_v48 = vadd.f32 %v4558_v50, %v1574_v51 }
 0x20e   : > { %v2128_v30 = vadd.f32 %v2044_v9, %v1850_v45  ;;  %v2321_v6 = vpop.f32.mrf.mxu3 }
 0x20f   : > { %v4643_v41 = vpop.f32.mrf.mxu1 }
 0x210   : > { %v4646_v16 = vadd.f32 %v2321_v6, %v2128_v30  ;;  %v4648_v42 = vpop.f32.mrf.mxu0  ;;  %v3328_v30 = vld [vmem:[%s3524_s10 + $0x151] sm:$0xff] }
 0x211   : > { %v5171_v6 = vld [vmem:[#allocation40_spill] sm:$0xff] }
 0x212   : > { %3235 = vmatmul.msk.f32.gmra.mxu1 %vm341_vm1, %v4221_v8  ;;  %3295 = vmatmul.msk.f32.gmra.mxu2 %vm341_vm1, %v3262_v28  ;;  %v1575_v28 = vadd.f32 %v5171_v6, %v4130_v13  ;;  %v3204_v13 = vld [vmem:[%s3524_s10 + $0x182] sm:$0xff] }
 0x213   : > { %3360 = vmatmul.msk.f32.gmra.mxu3 %vm341_vm1, %v3327_v23  ;;  %3424 = vmatmul.msk.f32.gmra.mxu0 %vm341_vm1, %v4149_v46 }
 0x214   : > { %v1852_v46 = vadd.f32 %v4575_v58, %v1575_v28  ;;  %v3205_v28 = vld [vmem:[%s3524_s10 + $0x18a] sm:$0xff] }
 0x215   : > { %v2047_v20 = vpop.f32.mrf.mxu2 }
 0x216   : > { %v2129_v34 = vadd.f32 %v2047_v20, %v1851_v48  ;;  %v2324_v4 = vpop.f32.mrf.mxu3  ;;  %v3264_v20 = vld [vmem:[%s3524_s10 + $0x158] sm:$0xff] }
 0x217   : > { %v4660_v45 = vpop.f32.mrf.mxu1 }
 0x218   : > { %v4663_v5 = vadd.f32 %v2324_v4, %v2129_v34  ;;  %v4665_v9 = vpop.f32.mrf.mxu0 }
 0x21a   : > { %3236 = vmatmul.msk.f32.gmra.mxu1 %vm341_vm1, %v4243_v31  ;;  %3296 = vmatmul.msk.f32.gmra.mxu2 %vm341_vm1, %v3263_v3  ;;  %v3329_v3 = vld [vmem:[%s3524_s10 + $0x159] sm:$0xff] }
 0x21b   : > { %3361 = vmatmul.msk.f32.gmra.mxu3 %vm341_vm1, %v3328_v30  ;;  %3425 = vmatmul.msk.f32.gmra.mxu0 %vm341_vm1, %v4167_v14 }
 0x21d   : > { %v2050_v50 = vpop.f32.mrf.mxu2 }
 0x21e   : > { %v2130_v23 = vadd.f32 %v2050_v50, %v1852_v46  ;;  %v2327_v51 = vpop.f32.mrf.mxu3  ;;  %v3265_v46 = vld [vmem:[%s3524_s10 + $0x168] sm:$0xff] }
 0x21f   : > { %v4677_v48 = vpop.f32.mrf.mxu1 }
 0x220   : > { %v2407_v34 = vadd.f32 %v2327_v51, %v2130_v23  ;;  %v2604_v4 = vpop.f32.mrf.mxu0  ;;  %v3330_v23 = vld [vmem:[%s3524_s10 + $0x169] sm:$0xff]  ;;  %v1583_v51 = vadd.f32 %v4288_v54, %v4286_v36  ;;  %v1584_v54 = vadd.f32 %v4304_v40, %v4302_v27  ;;  %v1585_v27 = vadd.f32 %v4320_v35, %v4318_v24  ;;  %v3269_v35 = vld [vmem:[%s3524_s10 + $0x198] sm:$0xff] }
 0x222   : > { %v4682_v6 = vadd.f32 %v2604_v4, %v2407_v34  ;;  %3237 = vmatmul.msk.f32.gmra.mxu1 %vm341_vm1, %v3204_v13  ;;  %3297 = vmatmul.msk.f32.gmra.mxu2 %vm341_vm1, %v3264_v20  ;;  %v3266_v4 = vld [vmem:[%s3524_s10 + $0x170] sm:$0xff] }
 0x223   : > { %3362 = vmatmul.msk.f32.gmra.mxu3 %vm341_vm1, %v3329_v3  ;;  %3426 = vmatmul.msk.f32.gmra.mxu0 %vm341_vm1, %v4185_v18 }
 0x225   : > { %v4689_v14 = vpop.f32.mrf.mxu2 }
 0x226   : > { %v4691_v58 = vpop.f32.mrf.mxu3 }
 0x227   : > { %v4693_v30 = vpop.f32.mrf.mxu1 }
 0x228   : > { %v4697_v50 = vpop.f32.mrf.mxu0 }
 0x22a   : > { %3238 = vmatmul.msk.f32.gmra.mxu1 %vm341_vm1, %v3205_v28  ;;  %3298 = vmatmul.msk.f32.gmra.mxu2 %vm341_vm1, %v3265_v46 }
 0x22b   : > { %3363 = vmatmul.msk.f32.gmra.mxu3 %vm341_vm1, %v3330_v23  ;;  %3427 = vmatmul.msk.f32.gmra.mxu0 %vm341_vm1, %v4203_v21 }
 0x22d   : > { %v4705_v18 = vpop.f32.mrf.mxu2 }
 0x22e   : > { %v4709_v20 = vpop.f32.mrf.mxu3 }
 0x22f   : > { %v1796_v34 = vpop.f32.mrf.mxu1 }
 0x230   : > { %v4712_v3 = vadd.f32 %v1796_v34, %v1583_v51  ;;  %v4714_v38 = vpop.f32.mrf.mxu0 }
 0x232   : > { %3299 = vmatmul.msk.f32.gmra.mxu2 %vm341_vm1, %v3266_v4 }
 0x233   : > { %3364 = vmatmul.msk.f32.gmra.mxu3 %vm341_vm1, %v3331_v15  ;;  %3428 = vmatmul.msk.f32.gmra.mxu0 %vm341_vm1, %v4221_v8 }
 0x235   : > { %v2059_v21 = vpop.f32.mrf.mxu2 }
 0x236   : > { %v4723_v36 = vpop.f32.mrf.mxu3 }
 0x237   : > { %v1799_v46 = vpop.f32.mrf.mxu1 }
 0x238   : > { %v4725_v23 = vadd.f32 %v1799_v46, %v1584_v54  ;;  %v4727_v51 = vpop.f32.mrf.mxu0 }
 0x23a   : > { %3300 = vmatmul.msk.f32.gmra.mxu2 %vm341_vm1, %v4228_v7  ;;  %v1586_v7 = vadd.f32 %v4336_v52, %v4334_v62  ;;  %v1580_v52 = vadd.f32 %v4225_v47, %v4223_v26  ;;  %v5173_v62 = vld [vmem:[#allocation4_spill] sm:$0xff]  ;;  %v5176_v26 = vld [vmem:[#allocation45_spill] sm:$0xff]  ;;  %v5177_v47 = vld [vmem:[#allocation46_spill] sm:$0xff] }
 0x23b   : > { %3365 = vmatmul.msk.f32.gmra.mxu3 %vm341_vm1, %v4253_v39  ;;  %3429 = vmatmul.msk.f32.gmra.mxu0 %vm341_vm1, %v4243_v31 }
 0x23d   : > { %v2062_v8 = vpop.f32.mrf.mxu2 }
 0x23e   : > { %v2339_v40 = vpop.f32.mrf.mxu3 }
 0x23f   : > { %v1802_v15 = vpop.f32.mrf.mxu1 }
 0x240   : > { %v4737_v34 = vadd.f32 %v1802_v15, %v1585_v27  ;;  %v4739_v4 = vpop.f32.mrf.mxu0  ;;  %v3334_v27 = vld [vmem:[%s3524_s10 + $0x199] sm:$0xff] }
 0x242   : > { %3301 = vmatmul.msk.f32.gmra.mxu2 %vm341_vm1, %v4250_v37 }
 0x243   : > { %3366 = vmatmul.msk.f32.gmra.mxu3 %vm341_vm1, %v4272_v17  ;;  %3430 = vmatmul.msk.f32.gmra.mxu0 %vm341_vm1, %v3204_v13  ;;  %v1581_v17 = vadd.f32 %v4247_v33, %v4245_v12  ;;  %v1587_v13 = vadd.f32 %v5173_v62, %v4350_v60  ;;  %v3335_v33 = vld [vmem:[%s3524_s10 + $0x1a1] sm:$0xff]  ;;  %v5178_v60 = vld [vmem:[#allocation49_spill] sm:$0xff] }
 0x244   : > { %v5179_v62 = vld [vmem:[#allocation50_spill] sm:$0xff] }
 0x245   : > { %v2065_v39 = vpop.f32.mrf.mxu2  ;;  %v1858_v15 = vadd.f32 %v4677_v48, %v1581_v17  ;;  %v1582_v48 = vadd.f32 %v5179_v62, %v5178_v60 }
 0x246   : > { %v2342_v31 = vpop.f32.mrf.mxu3 }
 0x247   : > { %v1805_v24 = vpop.f32.mrf.mxu1 }
 0x248   : > { %v4749_v54 = vadd.f32 %v1805_v24, %v1586_v7  ;;  %v2619_v46 = vpop.f32.mrf.mxu0 }
 0x24a   : > { %5172 = vst [vmem:[#allocation14_spill] sm:$0xff] %v4749_v54  ;;  %3302 = vmatmul.msk.f32.gmra.mxu2 %vm341_vm1, %v3269_v35  ;;  %v3270_v35 = vld [vmem:[%s3524_s10 + $0x1a0] sm:$0xff]  ;;  %v1578_v54 = vadd.f32 %v5177_v47, %v5176_v26 }
 0x24b   : > { %3367 = vmatmul.msk.f32.gmra.mxu3 %vm341_vm1, %v3334_v27  ;;  %3431 = vmatmul.msk.f32.gmra.mxu0 %vm341_vm1, %v3205_v28  ;;  %v5175_v27 = vld [vmem:[#allocation48_spill] sm:$0xff]  ;;  %v1857_v28 = vadd.f32 %v4660_v45, %v1580_v52  ;;  %v1859_v52 = vadd.f32 %v4693_v30, %v1582_v48  ;;  %v5183_v26 = vld [vmem:[#allocation42_spill] sm:$0xff] }
 0x24c   : > { %v1579_v19 = vadd.f32 %v5175_v27, %v5174_v53  ;;  %v5180_v53 = vld [vmem:[#allocation43_spill] sm:$0xff]  ;;  %v5181_v27 = vld [vmem:[#allocation44_spill] sm:$0xff] }
 0x24d   : > { %v2068_v37 = vpop.f32.mrf.mxu2  ;;  %v2135_v55 = vadd.f32 %v2065_v39, %v1857_v28  ;;  %v1577_v45 = vadd.f32 %v5181_v27, %v5180_v53  ;;  %v5184_v39 = vld [vmem:[#allocation2_spill] sm:$0xff] }
 0x24e   : > { %v2345_v7 = vpop.f32.mrf.mxu3  ;;  %v2136_v25 = vadd.f32 %v2068_v37, %v1858_v15  ;;  %v1856_v17 = vadd.f32 %v4643_v41, %v1579_v19  ;;  %v1855_v37 = vadd.f32 %v4626_v0, %v1578_v54 }
 0x24f   : > { %v1808_v24 = vpop.f32.mrf.mxu1  ;;  %v1854_v19 = vadd.f32 %v4609_v32, %v1577_v45  ;;  %v3400_v32 = vld [vmem:[%s3524_s10 + $0x1a2] sm:$0xff]  ;;  %v5187_v45 = vld [vmem:[#allocation5_spill] sm:$0xff] }
 0x250   : > { %v4766_v56 = vadd.f32 %v1808_v24, %v1587_v13  ;;  %v2622_v12 = vpop.f32.mrf.mxu0  ;;  %v2134_v13 = vadd.f32 %v2062_v8, %v1856_v17  ;;  %v2413_v15 = vadd.f32 %v2345_v7, %v2136_v25  ;;  %v5182_v24 = vld [vmem:[#allocation41_spill] sm:$0xff]  ;;  %v2133_v60 = vadd.f32 %v2059_v21, %v1855_v37 }
 0x251   : > { %v1576_v47 = vadd.f32 %v5183_v26, %v5182_v24  ;;  %v2132_v30 = vadd.f32 %v4705_v18, %v1854_v19 }
 0x252   : > { %3303 = vmatmul.msk.f32.gmra.mxu2 %vm341_vm1, %v3270_v35  ;;  %v5185_v35 = vld [vmem:[#allocation18_spill] sm:$0xff]  ;;  %v2411_v25 = vadd.f32 %v2339_v40, %v2134_v13  ;;  %v2690_v54 = vadd.f32 %v2622_v12, %v2413_v15  ;;  %v2410_v21 = vadd.f32 %v4723_v36, %v2133_v60 }
 0x253   : > { %3368 = vmatmul.msk.f32.gmra.mxu3 %vm341_vm1, %v3335_v33  ;;  %3432 = vmatmul.msk.f32.gmra.mxu0 %vm341_vm1, %v3399_v49  ;;  %v1588_v28 = vadd.f32 %v5185_v35, %v5184_v39  ;;  %v2412_v33 = vadd.f32 %v2342_v31, %v2135_v55  ;;  %v1853_v0 = vadd.f32 %v4592_v2, %v1576_v47  ;;  %v4796_v55 = vld [vmem:[%s5030_s2] ss:$0 sm:$0xff] }
 0x254   : > { %v2409_v18 = vadd.f32 %v4709_v20, %v2132_v30  ;;  %v2688_v40 = vadd.f32 %v4739_v4, %v2411_v25  ;;  %v2726_v12 = vadd.f32 %v4796_v55, %v2690_v54  ;;  %v2687_v36 = vadd.f32 %v4727_v51, %v2410_v21 }
 0x255   : > { %v2071_v41 = vpop.f32.mrf.mxu2  ;;  %v2131_v53 = vadd.f32 %v4689_v14, %v1853_v0  ;;  %v2689_v2 = vadd.f32 %v2619_v46, %v2412_v33  ;;  %v5186_v14 = vld [vmem:[#allocation15_spill] sm:$0xff]  ;;  %v2683_v30 = vadd.f32 %v4665_v9, %v4663_v5  ;;  %v2681_v9 = vadd.f32 %v4631_v63, %v4629_v10 }
 0x256   : > { %v2137_v62 = vadd.f32 %v2071_v41, %v1859_v52  ;;  %v2348_v49 = vpop.f32.mrf.mxu3  ;;  %v1589_v37 = vadd.f32 %v5187_v45, %v5186_v14  ;;  %v2686_v4 = vadd.f32 %v4714_v38, %v2409_v18  ;;  %v2724_v47 = vadd.f32 %v4796_v55, %v2688_v40  ;;  %v5188_v33 = vld [vmem:[#allocation3_spill] sm:$0xff]  ;;  %v5190_v40 = vld [vmem:[#allocation17_spill] sm:$0xff] }
 0x257   : > { %v1811_v8 = vpop.f32.mrf.mxu1  ;;  %v2408_v52 = vadd.f32 %v4691_v58, %v2131_v53  ;;  %v2725_v46 = vadd.f32 %v4796_v55, %v2689_v2  ;;  %v2758_v19 = vmax.f32 %v2726_v12, 0.0  ;;  %v2723_v51 = vadd.f32 %v4796_v55, %v2687_v36  ;;  %v5191_v12 = vld [vmem:[#allocation6_spill] sm:$0xff] }
 0x258   : > { %v4789_v7 = vadd.f32 %v1811_v8, %v1588_v28  ;;  %v2414_v48 = vadd.f32 %v2348_v49, %v2137_v62  ;;  %v2625_v17 = vpop.f32.mrf.mxu0  ;;  %v2756_v38 = vmax.f32 %v2724_v47, 0.0  ;;  %v5189_v62 = vld [vmem:[#allocation21_spill] sm:$0xff]  ;;  %v2679_v10 = vadd.f32 %v4597_v59, %v4595_v1 }
 0x259   : > { %v2685_v35 = vadd.f32 %v4697_v50, %v2408_v52  ;;  %v2757_v28 = vmax.f32 %v2725_v46, 0.0  ;;  %v1590_v49 = vadd.f32 %v5189_v62, %v5188_v33  ;;  %v2755_v50 = vmax.f32 %v2723_v51, 0.0 }
 0x25a   : > { %v2691_v31 = vadd.f32 %v2625_v17, %v2414_v48  ;;  %v2682_v48 = vadd.f32 %v4648_v42, %v4646_v16  ;;  %v2680_v16 = vadd.f32 %v4614_v57, %v4612_v22  ;;  %v2717_v63 = vadd.f32 %v4796_v55, %v2681_v9 }
 0x25b   : > { %3433 = vmatmul.msk.f32.gmra.mxu0 %vm341_vm1, %v3400_v32  ;;  %v2721_v8 = vadd.f32 %v4796_v55, %v2685_v35  ;;  %v2720_v32 = vadd.f32 %v4796_v55, %v4682_v6  ;;  %v2678_v22 = vadd.f32 %v4580_v11, %v4578_v43  ;;  %v2677_v1 = vadd.f32 %v4563_v29, %v4561_v61 }
 0x25c   : > { %v2727_v27 = vadd.f32 %v4796_v55, %v2691_v31  ;;  %v2718_v42 = vadd.f32 %v4796_v55, %v2682_v48  ;;  %v2715_v59 = vadd.f32 %v4796_v55, %v2679_v10 }
 0x25d   : > { %v2074_v13 = vpop.f32.mrf.mxu2  ;;  %v2753_v31 = vmax.f32 %v2721_v8, 0.0  ;;  %v2752_v6 = vmax.f32 %v2720_v32, 0.0  ;;  %v2714_v11 = vadd.f32 %v4796_v55, %v2678_v22 }
 0x25e   : > { %v2759_v15 = vmax.f32 %v2727_v27, 0.0  ;;  %v2138_v20 = vadd.f32 %v2074_v13, %v4712_v3  ;;  %v2351_v24 = vpop.f32.mrf.mxu3  ;;  %v2722_v3 = vadd.f32 %v4796_v55, %v2686_v4  ;;  %v1591_v27 = vadd.f32 %v5191_v12, %v5190_v40  ;;  %v5192_v4 = vld [vmem:[#allocation12_spill] sm:$0xff] }
 0x25f   : > { %v1814_v26 = vpop.f32.mrf.mxu1  ;;  %v2716_v13 = vadd.f32 %v4796_v55, %v2680_v16  ;;  %v2676_v43 = vadd.f32 %v5192_v4, %v4544_v44  ;;  %v2747_v29 = vmax.f32 %v2715_v59, 0.0 }
 0x260   : > { %v4812_v41 = vadd.f32 %v1814_v26, %v1589_v37  ;;  %v2415_v39 = vadd.f32 %v2351_v24, %v2138_v20  ;;  %2776 = vmatpush.msrb.mxu1 %v2759_v15  ;;  %v2628_v58 = vpop.f32.mrf.mxu0  ;;  %v2754_v53 = vmax.f32 %v2722_v3, 0.0  ;;  %v2750_v20 = vmax.f32 %v2718_v42, 0.0 }
 0x261   : > { %v2749_v24 = vmax.f32 %v2717_v63, 0.0  ;;  %v2748_v26 = vmax.f32 %v2716_v13, 0.0  ;;  %v2712_v35 = vadd.f32 %v4796_v55, %v2676_v43  ;;  %v2746_v3 = vmax.f32 %v2714_v11, 0.0 }
 0x262   : > { %v4816_v60 = vadd.f32 %v2628_v58, %v2415_v39  ;;  %2777 = vmatpush.msrb.mxu1 %v2758_v19  ;;  %v2713_v19 = vadd.f32 %v4796_v55, %v2677_v1  ;;  %v5193_v39 = vld [vmem:[#allocation14_spill] sm:$0xff] }
 0x263   : > { %v2744_v33 = vmax.f32 %v2712_v35, 0.0 }
 0x264   : > { %2778 = vmatpush.msrb.mxu1 %v2757_v28  ;;  %v2745_v44 = vmax.f32 %v2713_v19, 0.0 }
 0x265   : > { %v2077_v0 = vpop.f32.mrf.mxu2 }
 0x266   : > { %v2139_v25 = vadd.f32 %v2077_v0, %v4725_v23  ;;  %2779 = vmatpush.msrb.mxu1 %v2756_v38  ;;  %v2354_v54 = vpop.f32.mrf.mxu3  ;;  %v2719_v23 = vadd.f32 %v4796_v55, %v2683_v30 }
 0x267   : > { %v1817_v17 = vpop.f32.mrf.mxu1 }
 0x268   : > { %v4829_v21 = vadd.f32 %v1817_v17, %v1590_v49  ;;  %v2416_v2 = vadd.f32 %v2354_v54, %v2139_v25  ;;  %2780 = vmatpush.msrb.mxu1 %v2755_v50  ;;  %v2631_v5 = vpop.f32.mrf.mxu0  ;;  %v2751_v52 = vmax.f32 %v2719_v23, 0.0 }
 0x26a   : > { %v4834_v18 = vadd.f32 %v2631_v5, %v2416_v2  ;;  %2781 = vmatpush.msrb.mxu1 %v2754_v53 }
 0x26c   : > { %2782 = vmatpush.msrb.mxu1 %v2753_v31 }
 0x26d   : > { %v2080_v14 = vpop.f32.mrf.mxu2 }
 0x26e   : > { %v2140_v45 = vadd.f32 %v2080_v14, %v4737_v34  ;;  %2783 = vmatpush.msrb.mxu1 %v2752_v6  ;;  %v2357_v37 = vpop.f32.mrf.mxu3 }
 0x26f   : > { %v1820_v57 = vpop.f32.mrf.mxu1 }
 0x270   : > { %v1868_v36 = vadd.f32 %v1820_v57, %v1591_v27  ;;  %v2417_v46 = vadd.f32 %v2357_v37, %v2140_v45  ;;  %2784 = vmatpush.msrb.mxu1 %v2751_v52  ;;  %v2634_v15 = vpop.f32.mrf.mxu0 }
 0x272   : > { %v4851_v34 = vadd.f32 %v2634_v15, %v2417_v46  ;;  %2785 = vmatpush.msrb.mxu1 %v2750_v20 }
 0x274   : > { %2786 = vmatpush.msrb.mxu1 %v2749_v24 }
 0x275   : > { %v2083_v47 = vpop.f32.mrf.mxu2 }
 0x276   : > { %v2141_v58 = vadd.f32 %v2083_v47, %v5193_v39  ;;  %2787 = vmatpush.msrb.mxu1 %v2748_v26  ;;  %v2360_v61 = vpop.f32.mrf.mxu3 }
 0x277   : > { %v1823_v16 = vpop.f32.mrf.mxu1 }
 0x278   : > { %v2418_v51 = vadd.f32 %v2360_v61, %v2141_v58  ;;  %2788 = vmatpush.msrb.mxu1 %v2747_v29  ;;  %v2637_v28 = vpop.f32.mrf.mxu0  ;;  %v5194_v61 = vld [vmem:[#allocation29_spill] sm:$0xff]  ;;  %v5195_v29 = vld [vmem:[#allocation10_spill] sm:$0xff] }
 0x279   : > { %v1597_v35 = vadd.f32 %v5195_v29, %v5194_v61 }
 0x27a   : > { %v4859_v38 = vadd.f32 %v2637_v28, %v2418_v51  ;;  %2789 = vmatpush.msrb.mxu1 %v2746_v3  ;;  %v5196_v28 = vld [vmem:[#allocation9_spill] sm:$0xff]  ;;  %v5197_v3 = vld [vmem:[#allocation11_spill] sm:$0xff] }
 0x27c   : > { %2790 = vmatpush.msrb.mxu1 %v2745_v44  ;;  %v1596_v44 = vadd.f32 %v5197_v3, %v5196_v28 }
 0x27d   : > { %v2086_v62 = vpop.f32.mrf.mxu2 }
 0x27e   : > { %v2142_v49 = vadd.f32 %v2086_v62, %v4766_v56  ;;  %2791 = vmatpush.msrb.mxu1 %v2744_v33  ;;  %v2363_v0 = vpop.f32.mrf.mxu3 }
 0x27f   : > { %v1826_v45 = vpop.f32.mrf.mxu1 }
 0x280   : > { %v2419_v30 = vadd.f32 %v2363_v0, %v2142_v49  ;;  %v2640_v8 = vpop.f32.mrf.mxu0  ;;  %v5198_v49 = vld [vmem:[#allocation30_spill] sm:$0xff] }
 0x281   : > { %v5199_v0 = vld [vmem:[#allocation26_spill] sm:$0xff] }
 0x282   : > { %v4862_v50 = vadd.f32 %v2640_v8, %v2419_v30  ;;  %v1595_v30 = vadd.f32 %v5199_v0, %v5198_v49 }
 0x285   : > { %v2089_v25 = vpop.f32.mrf.mxu2 }
 0x286   : > { %v2143_v54 = vadd.f32 %v2089_v25, %v4789_v7  ;;  %v2366_v48 = vpop.f32.mrf.mxu3 }
 0x287   : > { %v1829_v46 = vpop.f32.mrf.mxu1 }
 0x288   : > { %v2420_v17 = vadd.f32 %v2366_v48, %v2143_v54  ;;  %v2643_v32 = vpop.f32.mrf.mxu0 }
 0x28a   : > { %v4865_v53 = vadd.f32 %v2643_v32, %v2420_v17  ;;  %v5200_v17 = vld [vmem:[#allocation23_spill] sm:$0xff]  ;;  %v5201_v32 = vld [vmem:[#allocation8_spill] sm:$0xff] }
 0x28d   : > { %v2092_v2 = vpop.f32.mrf.mxu2 }
 0x28e   : > { %v2144_v5 = vadd.f32 %v2092_v2, %v4812_v41  ;;  %v2369_v9 = vpop.f32.mrf.mxu3  ;;  %v1594_v2 = vadd.f32 %v5201_v32, %v5200_v17  ;;  %v2828_v17 = vld [vmem:[%s5031_s3 + $0x60] sm:$0xff] }
 0x28f   : > { %v1832_v1 = vpop.f32.mrf.mxu1 }
 0x290   : > { %v2421_v23 = vadd.f32 %v2369_v9, %v2144_v5  ;;  %v2646_v56 = vpop.f32.mrf.mxu0  ;;  %v5202_v5 = vld [vmem:[#allocation13_spill] sm:$0xff]  ;;  %v5203_v9 = vld [vmem:[#allocation32_spill] sm:$0xff] }
 0x292   : > { %v4868_v31 = vadd.f32 %v2646_v56, %v2421_v23  ;;  %v1598_v23 = vadd.f32 %v5203_v9, %v5202_v5  ;;  %v1872_v56 = vadd.f32 %v1832_v1, %v1595_v30  ;;  %v2826_v9 = vld [vmem:[%s5031_s3 + $0x50] sm:$0xff] }
 0x295   : > { %v2095_v42 = vpop.f32.mrf.mxu2 }
 0x296   : > { %v2145_v6 = vadd.f32 %v2095_v42, %v4829_v21  ;;  %v2372_v40 = vpop.f32.mrf.mxu3 }
 0x297   : > { %v1835_v43 = vpop.f32.mrf.mxu1 }
 0x298   : > { %v2422_v12 = vadd.f32 %v2372_v40, %v2145_v6  ;;  %v2649_v7 = vpop.f32.mrf.mxu0  ;;  %v1873_v8 = vadd.f32 %v1835_v43, %v1596_v44  ;;  %v5204_v6 = vld [vmem:[#allocation7_spill] sm:$0xff] }
 0x299   : > { %v5205_v40 = vld [vmem:[#allocation27_spill] sm:$0xff] }
 0x29a   : > { %v4871_v27 = vadd.f32 %v2649_v7, %v2422_v12  ;;  %v1593_v12 = vadd.f32 %v5205_v40, %v5204_v6  ;;  %v1871_v7 = vadd.f32 %v1829_v46, %v1594_v2  ;;  %v2827_v2 = vld [vmem:[%s5031_s3 + $0x58] sm:$0xff] }
 0x29c   : > { %v1870_v61 = vadd.f32 %v1826_v45, %v1593_v12  ;;  %v2735_v6 = vadd.f32 %v4796_v55, %v4871_v27  ;;  %v2824_v12 = vld [vmem:[%s5031_s3 + $0x40] sm:$0xff]  ;;  %v2733_v27 = vadd.f32 %v4796_v55, %v4865_v53  ;;  %v2731_v53 = vadd.f32 %v4796_v55, %v4859_v38 }
 0x29d   : > { %v2098_v14 = vpop.f32.mrf.mxu2  ;;  %v2729_v38 = vadd.f32 %v4796_v55, %v4834_v18  ;;  %v2816_v18 = vld [vmem:[%s5031_s3] sm:$0xff] }
 0x29e   : > { %v2146_v10 = vadd.f32 %v2098_v14, %v1868_v36  ;;  %v2375_v63 = vpop.f32.mrf.mxu3 }
 0x29f   : > { %v1838_v39 = vpop.f32.mrf.mxu1 }
 0x2a0   : > { %v2423_v37 = vadd.f32 %v2375_v63, %v2146_v10  ;;  %v2652_v41 = vpop.f32.mrf.mxu0  ;;  %v1874_v33 = vadd.f32 %v1838_v39, %v1597_v35 }
 0x2a2   : > { %v4873_v52 = vadd.f32 %v2652_v41, %v2423_v37  ;;  %v5206_v37 = vld [vmem:[#allocation24_spill] sm:$0xff] }
 0x2a3   : > { %v5207_v41 = vld [vmem:[#allocation20_spill] sm:$0xff] }
 0x2a4   : > { %v1592_v43 = vadd.f32 %v5207_v41, %v5206_v37  ;;  %v2821_v41 = vld [vmem:[%s5031_s3 + $0x28] sm:$0xff] }
 0x2a5   : > { %v2101_v22 = vpop.f32.mrf.mxu2 }
 0x2a6   : > { %v2378_v57 = vpop.f32.mrf.mxu3  ;;  %v1869_v3 = vadd.f32 %v1823_v16, %v1592_v43  ;;  %v2765_v43 = vmax.f32 %v2733_v27, 0.0 }
 0x2a7   : > { %v1841_v48 = vpop.f32.mrf.mxu1 }
 0x2a8   : > { %v4875_v13 = vpop.f32.mrf.mxu0  ;;  %v1875_v14 = vadd.f32 %v1841_v48, %v1598_v23  ;;  %v2147_v0 = vadd.f32 %v2101_v22, %v1869_v3  ;;  %v2830_v22 = vld [vmem:[%s5031_s3 + $0x70] sm:$0xff]  ;;  %v2736_v23 = vadd.f32 %v4796_v55, %v4873_v52  ;;  %v2734_v52 = vadd.f32 %v4796_v55, %v4868_v31  ;;  %v2817_v3 = vld [vmem:[%s5031_s3 + $0x8] sm:$0xff] }
 0x2a9   : > { %v2732_v31 = vadd.f32 %v4796_v55, %v4862_v50  ;;  %v2730_v50 = vadd.f32 %v4796_v55, %v4851_v34  ;;  %v2728_v34 = vadd.f32 %v4796_v55, %v4816_v60  ;;  %v2868_v60 = vld [vmem:[%s5033_s5 + $0x70] sm:$0xff] }
 0x2aa   : > { %v2766_v37 = vmax.f32 %v2734_v52, 0.0 }
 0x2ad   : > { %v2104_v15 = vpop.f32.mrf.mxu2 }
 0x2ae   : > { %v2381_v21 = vpop.f32.mrf.mxu3  ;;  %v2148_v44 = vadd.f32 %v2104_v15, %v1870_v61  ;;  %v2831_v15 = vld [vmem:[%s5031_s3 + $0x78] sm:$0xff]  ;;  %v2764_v61 = vmax.f32 %v2732_v31, 0.0 }
 0x2af   : > { %2833 = vmatpush.msrb.mxu3 %v2831_v15  ;;  %v2855_v15 = vld [vmem:[%s5033_s5 + $0x8] sm:$0xff] }
 0x2b0   : > { %v2658_v20 = vpop.f32.mrf.mxu0 }
 0x2b1   : > { %2834 = vmatpush.msrb.mxu3 %v2830_v22  ;;  %v2854_v22 = vld [vmem:[%s5033_s5] sm:$0xff] }
 0x2b5   : > { %v2107_v59 = vpop.f32.mrf.mxu2 }
 0x2b6   : > { %v2384_v24 = vpop.f32.mrf.mxu3  ;;  %v2149_v29 = vadd.f32 %v2107_v59, %v1871_v7  ;;  %v2424_v59 = vadd.f32 %v2378_v57, %v2147_v0  ;;  %v2768_v7 = vmax.f32 %v2736_v23, 0.0  ;;  %v2864_v0 = vld [vmem:[%s5033_s5 + $0x50] sm:$0xff] }
 0x2b8   : > { %v2661_v4 = vpop.f32.mrf.mxu0  ;;  %v2426_v46 = vadd.f32 %v2384_v24, %v2149_v29  ;;  %v2819_v29 = vld [vmem:[%s5031_s3 + $0x18] sm:$0xff] }
 0x2bd   : > { %v2110_v36 = vpop.f32.mrf.mxu2 }
 0x2be   : > { %v2387_v11 = vpop.f32.mrf.mxu3  ;;  %v2150_v10 = vadd.f32 %v2110_v36, %v1872_v56 }
 0x2c0   : > { %v2664_v26 = vpop.f32.mrf.mxu0  ;;  %v2427_v1 = vadd.f32 %v2387_v11, %v2150_v10  ;;  %v2767_v10 = vmax.f32 %v2735_v6, 0.0 }
 0x2c5   : > { %v2113_v47 = vpop.f32.mrf.mxu2 }
 0x2c6   : > { %v2390_v19 = vpop.f32.mrf.mxu3  ;;  %v2151_v42 = vadd.f32 %v2113_v47, %v1873_v8  ;;  %v2704_v8 = vadd.f32 %v2664_v26, %v2427_v1  ;;  %v2701_v26 = vadd.f32 %v4875_v13, %v2424_v59  ;;  %v2760_v1 = vmax.f32 %v2728_v34, 0.0 }
 0x2c8   : > { %v2667_v58 = vpop.f32.mrf.mxu0  ;;  %v2428_v35 = vadd.f32 %v2390_v19, %v2151_v42  ;;  %v2703_v19 = vadd.f32 %v2661_v4, %v2426_v46  ;;  %v2740_v11 = vadd.f32 %v4796_v55, %v2704_v8  ;;  %v2829_v4 = vld [vmem:[%s5031_s3 + $0x68] sm:$0xff]  ;;  %v2737_v13 = vadd.f32 %v4796_v55, %v2701_v26 }
 0x2c9   : > { %2835 = vmatpush.msrb.mxu3 %v2829_v4  ;;  %v2825_v42 = vld [vmem:[%s5031_s3 + $0x48] sm:$0xff]  ;;  %v2870_v4 = vld [vmem:[%s5034_s6] sm:$0x1] }
 0x2ca   : > { %v2705_v30 = vadd.f32 %v2667_v58, %v2428_v35  ;;  %v2739_v58 = vadd.f32 %v4796_v55, %v2703_v19  ;;  %v2772_v32 = vmax.f32 %v2740_v11, 0.0  ;;  %v2769_v40 = vmax.f32 %v2737_v13, 0.0  ;;  %v2863_v46 = vld [vmem:[%s5033_s5 + $0x48] sm:$0xff] }
 0x2cb   : > { %2836 = vmatpush.msrb.mxu3 %v2828_v17  ;;  %v2763_v35 = vmax.f32 %v2731_v53, 0.0  ;;  %v2859_v8 = vld [vmem:[%s5033_s5 + $0x28] sm:$0xff] }
 0x2cc   : > { %v2741_v48 = vadd.f32 %v4796_v55, %v2705_v30  ;;  %v2771_v5 = vmax.f32 %v2739_v58, 0.0  ;;  %v2862_v30 = vld [vmem:[%s5033_s5 + $0x40] sm:$0xff] }
 0x2cd   : > { %v2116_v51 = vpop.f32.mrf.mxu2  ;;  %2837 = vmatpush.msrb.mxu3 %v2827_v2 }
 0x2ce   : > { %v2393_v62 = vpop.f32.mrf.mxu3  ;;  %v2152_v25 = vadd.f32 %v2116_v51, %v1874_v33 }
 0x2cf   : > { %2838 = vmatpush.msrb.mxu3 %v2826_v9 }
 0x2d0   : > { %v2670_v54 = vpop.f32.mrf.mxu0  ;;  %v2429_v63 = vadd.f32 %v2393_v62, %v2152_v25  ;;  %v2425_v62 = vadd.f32 %v2381_v21, %v2148_v44  ;;  %v3458_v21 = vmov 0.00390625   ;;  %v2761_v44 = vmax.f32 %v2729_v38, 0.0 }
 0x2d1   : > { %2792 = vmatmul.f32.vlgmr.msrb.gmra.mxu1 %v3458_v21  ;;  %2839 = vmatpush.msrb.mxu3 %v2825_v42 }
 0x2d2   : > { %v2706_v47 = vadd.f32 %v2670_v54, %v2429_v63  ;;  %v2702_v24 = vadd.f32 %v2658_v20, %v2425_v62  ;;  %v2773_v54 = vmax.f32 %v2741_v48, 0.0  ;;  %v2822_v63 = vld [vmem:[%s5031_s3 + $0x30] sm:$0xff] }
 0x2d3   : > { %2840 = vmatpush.msrb.mxu3 %v2824_v12  ;;  %v2860_v62 = vld [vmem:[%s5033_s5 + $0x30] sm:$0xff] }
 0x2d4   : > { %v2742_v25 = vadd.f32 %v4796_v55, %v2706_v47  ;;  %v2738_v20 = vadd.f32 %v4796_v55, %v2702_v24  ;;  %v2867_v47 = vld [vmem:[%s5033_s5 + $0x68] sm:$0xff] }
 0x2d5   : > { %v2119_v39 = vpop.f32.mrf.mxu2 }
 0x2d6   : > { %v2153_v51 = vadd.f32 %v2119_v39, %v1875_v14  ;;  %v2396_v28 = vpop.f32.mrf.mxu3  ;;  %v2774_v57 = vmax.f32 %v2742_v25, 0.0  ;;  %v2770_v56 = vmax.f32 %v2738_v20, 0.0  ;;  %v2823_v14 = vld [vmem:[%s5031_s3 + $0x38] sm:$0xff]  ;;  %v2820_v39 = vld [vmem:[%s5031_s3 + $0x20] sm:$0xff] }
 0x2d7   : > { %2841 = vmatpush.msrb.mxu3 %v2823_v14  ;;  %v2858_v25 = vld [vmem:[%s5033_s5 + $0x20] sm:$0xff] }
 0x2d8   : > { %v2430_v33 = vadd.f32 %v2396_v28, %v2153_v51  ;;  %v2673_v49 = vpop.f32.mrf.mxu0  ;;  %v2818_v51 = vld [vmem:[%s5031_s3 + $0x10] sm:$0xff]  ;;  %v2762_v28 = vmax.f32 %v2730_v50, 0.0 }
 0x2d9   : > { %2842 = vmatpush.msrb.mxu3 %v2822_v63 }
 0x2da   : > { %v2707_v36 = vadd.f32 %v2673_v49, %v2430_v33  ;;  %v2866_v33 = vld [vmem:[%s5033_s5 + $0x60] sm:$0xff]  ;;  %v2865_v49 = vld [vmem:[%s5033_s5 + $0x58] sm:$0xff] }
 0x2db   : > { %2843 = vmatpush.msrb.mxu3 %v2821_v41 }
 0x2dc   : > { %v2743_v45 = vadd.f32 %v4796_v55, %v2707_v36  ;;  %v2869_v55 = vld [vmem:[%s5033_s5 + $0x78] sm:$0xff] }
 0x2dd   : > { %2844 = vmatpush.msrb.mxu3 %v2820_v39  ;;  %2871 = vmatpush.msra.mxu1 %v2869_v55  ;;  %v2861_v36 = vld [vmem:[%s5033_s5 + $0x38] sm:$0xff] }
 0x2de   : > { %v2775_v16 = vmax.f32 %v2743_v45, 0.0  ;;  %v2857_v45 = vld [vmem:[%s5033_s5 + $0x18] sm:$0xff] }
 0x2df   : > { %2845 = vmatpush.msrb.mxu3 %v2819_v29  ;;  %2872 = vmatpush.msra.mxu1 %v2868_v60 }
 0x2e0   : > { %2796 = vmatpush.msrb.mxu2 %v2775_v16  ;;  %v2856_v16 = vld [vmem:[%s5033_s5 + $0x10] sm:$0xff] }
 0x2e1   : > { %2846 = vmatpush.msrb.mxu3 %v2818_v51  ;;  %2873 = vmatpush.msra.mxu1 %v2867_v47 }
 0x2e2   : > { %2797 = vmatpush.msrb.mxu2 %v2774_v57 }
 0x2e3   : > { %2847 = vmatpush.msrb.mxu3 %v2817_v3  ;;  %2874 = vmatpush.msra.mxu1 %v2866_v33 }
 0x2e4   : > { %2798 = vmatpush.msrb.mxu2 %v2773_v54 }
 0x2e5   : > { %2848 = vmatpush.msrb.mxu3 %v2816_v18  ;;  %2875 = vmatpush.msra.mxu1 %v2865_v49 }
 0x2e6   : > { %2799 = vmatpush.msrb.mxu2 %v2772_v32 }
 0x2e7   : > { %2876 = vmatpush.msra.mxu1 %v2864_v0 }
 0x2e8   : > { %2800 = vmatpush.msrb.mxu2 %v2771_v5 }
 0x2e9   : > { %2877 = vmatpush.msra.mxu1 %v2863_v46 }
 0x2ea   : > { %2801 = vmatpush.msrb.mxu2 %v2770_v56 }
 0x2eb   : > { %2878 = vmatpush.msra.mxu1 %v2862_v30 }
 0x2ec   : > { %2802 = vmatpush.msrb.mxu2 %v2769_v40 }
 0x2ed   : > { %2879 = vmatpush.msra.mxu1 %v2861_v36 }
 0x2ee   : > { %2803 = vmatpush.msrb.mxu2 %v2768_v7 }
 0x2ef   : > { %2880 = vmatpush.msra.mxu1 %v2860_v62 }
 0x2f0   : > { %2804 = vmatpush.msrb.mxu2 %v2767_v10 }
 0x2f1   : > { %2881 = vmatpush.msra.mxu1 %v2859_v8 }
 0x2f2   : > { %2805 = vmatpush.msrb.mxu2 %v2766_v37 }
 0x2f3   : > { %2882 = vmatpush.msra.mxu1 %v2858_v25 }
 0x2f4   : > { %2806 = vmatpush.msrb.mxu2 %v2765_v43 }
 0x2f5   : > { %2883 = vmatpush.msra.mxu1 %v2857_v45 }
 0x2f6   : > { %2807 = vmatpush.msrb.mxu2 %v2764_v61 }
 0x2f7   : > { %2884 = vmatpush.msra.mxu1 %v2856_v16 }
 0x2f8   : > { %2808 = vmatpush.msrb.mxu2 %v2763_v35 }
 0x2f9   : > { %2885 = vmatpush.msra.mxu1 %v2855_v15 }
 0x2fa   : > { %2809 = vmatpush.msrb.mxu2 %v2762_v28 }
 0x2fb   : > { %2886 = vmatpush.msra.mxu1 %v2854_v22 }
 0x2fc   : > { %2810 = vmatpush.msrb.mxu2 %v2761_v44 }
 0x2fe   : > { %2811 = vmatpush.msrb.mxu2 %v2760_v1 }
 0x2ff   : > { %2812 = vmatmul.f32.vlgmr.msrb.gmra.mxu2 %v3458_v21  ;;  %v2832_v21 = vld [vmem:[%s5032_s4] sm:$0x1] }
 0x34e   : > { %v2793_v59 = vpop.f32.mrf.mxu1 }
 0x382   : > { %v2813_v19 = vpop.f32.mrf.mxu2 }
 0x383   : > { %v2814_v48 = vadd.f32 %v2813_v19, %v2793_v59 }
 0x385   : > { %2849 = vmatmul.f32.vlgmr.msrb.gmra.mxu3 %v2814_v48 }
 0x408   : > { %v2850_v24 = vpop.f32.mrf.mxu3 }
 0x409   : > { %v2851_v11 = vadd.f32 %v2850_v24, %v2832_v21 }
 0x40b   : > { %v2853_v57 = vmax.f32 %v2851_v11, 0.0 }
 0x40d   : > { %2887 = vmatmul.f32.vlgmr.msra.gmra.mxu1 %v2853_v57 }
 0x48a   : > { %v2888_v26 = vpop.f32.mrf.mxu1 }
 0x48b   : > { %v2889_v58 = vadd.f32 %v2888_v26, %v2870_v4 }
 0x48d   : > { %2891 = vst [vmem:[%s274_s13] sm:$0x1] %v2889_v58 }
 0x48e PF: > { %s17_s24 = sadd.s32 1, %s3456_s24  }
 0x48f   : > { %p14_p4 = scmp.ge.s32.totalorder %s17_s24, 4  }
 0x491   :  { %16 = sbr.rel (!%p14_p4) target bundleno = 1 (0x1), region = 80 }

</bundles_post_ra>
